<compile_context>
chip_gen: v7x
topology: tpu7x:2x2x1
jax: 0.10.0
libtpu: 0.0.40
codegen_flags: <defaults>
</compile_context>

<pallas_src>
import math
import jax
import jax.numpy as jnp
from jax.experimental import pallas as pl
from jax.experimental.pallas import tpu as pltpu

# ---- small synthetic BERT config ----
VOCAB = 128
HIDDEN = 64
HP = 128                        # hidden zero-padded to a full 128-lane vreg
N_LAYERS = 2
N_HEADS = 4
HEAD_DIM = HIDDEN // N_HEADS
INTER = 128
MAX_POS = 32
SEQ = 8
BATCH = 2
EPS = 1e-12                     # BERT layer_norm_eps
ATT_SCALE = 1.0 / math.sqrt(HEAD_DIM)

# merged bf16 weight-slab column layout (all offsets 128-lane aligned)
C_W1 = 0                        # (HP, INTER)  rows >= HIDDEN are zero
C_W2 = C_W1 + INTER             # (INTER, HP)  cols >= HIDDEN are zero
C_WO = C_W2 + HP                # (HP, HP)     only [0:HIDDEN, 0:HIDDEN] is real
C_QKV = C_WO + HP               # (HP, 3*HIDDEN) rows >= HIDDEN are zero, Q cols pre-scaled
W_COLS = C_QKV + 3 * HIDDEN     # = 576
VEC_COLS = 256                  # packed per-layer vectors (row 0 holds the 192-wide qkv bias)


def _layernorm_padded(x, g, b):
    """LayerNorm over the true HIDDEN features of an [M, HP] activation whose pad
    columns (>= HIDDEN) are identically zero.  g/b are zero in the pad region, so the
    pad columns stay exactly zero after normalization."""
    inv_n = 1.0 / HIDDEN
    mu = jnp.sum(x, axis=-1, keepdims=True) * inv_n
    var = jnp.sum(x * x, axis=-1, keepdims=True) * inv_n - mu * mu
    return (x - mu) * jax.lax.rsqrt(var + EPS) * g + b


# ----------------- fused whole-encoder kernel (no grid) -----------------

def bert_encoder_kernel(slab_ref, embln_ref, wslab_ref, vecs_ref, o_ref):
    B = slab_ref.shape[0]
    M = B * SEQ

    # Embeddings (+ the packed attention-mask bias row) and embedding LayerNorm.
    emb = slab_ref[:, 0:SEQ, :].reshape(M, HP)                 # f32, pad cols are zero
    maskb = slab_ref[:, SEQ:SEQ + 1, 0:SEQ]                    # (B, 1, S) additive bias
    x = _layernorm_padded(emb, embln_ref[0:1, :], embln_ref[1:2, :])

    # Layer loop unrolled in-kernel; all layers' weights are already resident in VMEM.
    for l in range(N_LAYERS):
        w1 = wslab_ref[l, :, C_W1:C_W1 + INTER]                      # (HP, INTER) bf16
        w2 = wslab_ref[l, :, C_W2:C_W2 + HP]                         # (INTER, HP) bf16
        wo = wslab_ref[l, 0:HIDDEN, C_WO:C_WO + HP]                  # (H, HP)     bf16
        wqkv = wslab_ref[l, :, C_QKV:C_QKV + 3 * HIDDEN]             # (HP, 3H)    bf16

        bqkv = vecs_ref[l, 0:1, 0:3 * HIDDEN]                        # Q segment pre-scaled
        bo = vecs_ref[l, 1:2, 0:HP]
        ln1g = vecs_ref[l, 2:3, 0:HP]
        ln1b = vecs_ref[l, 3:4, 0:HP]
        bf1 = vecs_ref[l, 4:5, 0:INTER]
        bf2 = vecs_ref[l, 5:6, 0:HP]
        ln2g = vecs_ref[l, 6:7, 0:HP]
        ln2b = vecs_ref[l, 7:8, 0:HP]

        # ---- self-attention ----
        xb = x.astype(jnp.bfloat16)
        qkv = jnp.dot(xb, wqkv, preferred_element_type=jnp.float32) + bqkv    # (M, 3H)

        ctx_heads = []
        for h in range(N_HEADS):
            q = qkv[:, h * HEAD_DIM:(h + 1) * HEAD_DIM].reshape(B, SEQ, HEAD_DIM)
            k = qkv[:, HIDDEN + h * HEAD_DIM:
                       HIDDEN + (h + 1) * HEAD_DIM].reshape(B, SEQ, HEAD_DIM)
            v = qkv[:, 2 * HIDDEN + h * HEAD_DIM:
                       2 * HIDDEN + (h + 1) * HEAD_DIM].reshape(B, SEQ, HEAD_DIM)

            s = jnp.einsum('bqd,bkd->bqk',
                           q.astype(jnp.bfloat16), k.astype(jnp.bfloat16),
                           preferred_element_type=jnp.float32)                # (B, S, S)
            s = s + maskb
            s = s - jnp.max(s, axis=-1, keepdims=True)
            p = jnp.exp(s)
            p = p * pl.reciprocal(jnp.sum(p, axis=-1, keepdims=True), approx=True)

            ctx_heads.append(jnp.einsum('bqk,bkd->bqd',
                                        p.astype(jnp.bfloat16), v.astype(jnp.bfloat16),
                                        preferred_element_type=jnp.float32))  # (B, S, D)

        ctx = jnp.concatenate(ctx_heads, axis=-1).reshape(M, HIDDEN)          # (M, H)

        attn = jnp.dot(ctx.astype(jnp.bfloat16), wo,
                       preferred_element_type=jnp.float32) + bo               # (M, HP)
        x1 = _layernorm_padded(x + attn, ln1g, ln1b)

        # ---- feed-forward ----
        h1 = jnp.dot(x1.astype(jnp.bfloat16), w1,
                     preferred_element_type=jnp.float32) + bf1                # (M, INTER)
        # TODO(synk): HF BertModel uses exact (erf) GELU; tanh approximation used here.
        h1 = jax.nn.gelu(h1, approximate=True)
        h2 = jnp.dot(h1.astype(jnp.bfloat16), w2,
                     preferred_element_type=jnp.float32) + bf2                # (M, HP)
        x = _layernorm_padded(x1 + h2, ln2g, ln2b)

    o_ref[...] = x.reshape(B, SEQ, HP)


# ----------------- wrapper -----------------

def pallas_bert_encoder(slab, embln, wslab, vecs):
    B = slab.shape[0]
    vmem = lambda: pl.BlockSpec(memory_space=pltpu.MemorySpace.VMEM)
    return pl.pallas_call(
        bert_encoder_kernel,
        out_shape=jax.ShapeDtypeStruct((B, SEQ, HP), jnp.float32),
        in_specs=[vmem(), vmem(), vmem(), vmem()],
        out_specs=vmem(),
    )(slab, embln, wslab, vecs)


def bert_forward(params, input_ids, attention_masks):
    B, S = input_ids.shape
    # Embedding gathers are plain-JAX glue; tables are pre-padded to HP=128 lanes.
    # TODO(synk): token_type_ids assumed all zero (type_emb[0]).
    emb = (params["word_emb"][input_ids]
           + params["pos_emb"][:S][None, :, :]
           + params["type_emb"][0][None, None, :]).astype(jnp.float32)        # (B, S, HP)

    # BERT additive mask bias packed into spare rows of the embedding slab
    # (row SEQ, lanes [0:S); remaining pad rows keep the slab sublane-aligned).
    maskbias = (1.0 - attention_masks.astype(jnp.float32)) * -1e9             # (B, S)
    extra = jnp.zeros((B, 8, HP), jnp.float32).at[:, 0, :S].set(maskbias)
    slab = jnp.concatenate([emb, extra], axis=1)                              # (B, S+8, HP)

    hidden = pallas_bert_encoder(slab, params["embln"], params["wslab"], params["vecs"])

    # last_hidden_state[:, 0]  -> [batch, hidden]   (drop the lane padding)
    return hidden[:, 0, :HIDDEN]


# ----------------- deterministic parameter init -----------------

def init_params(key):
    def nrm(k, shape, std=0.02):
        return (std * jax.random.normal(k, shape)).astype(jnp.float32)

    def pad_last(a, width):
        out = jnp.zeros(a.shape[:-1] + (width,), jnp.float32)
        return out.at[..., :a.shape[-1]].set(a)

    keys = iter(jax.random.split(key, 3 + N_LAYERS * 6))

    word_emb = pad_last(nrm(next(keys), (VOCAB, HIDDEN)), HP)
    pos_emb = pad_last(nrm(next(keys), (MAX_POS, HIDDEN)), HP)
    type_emb = pad_last(nrm(next(keys), (2, HIDDEN)), HP)
    embln = jnp.zeros((2, HP), jnp.float32).at[0, :HIDDEN].set(1.0)   # row0 gamma, row1 beta

    wslab_l, vecs_l = [], []
    for _ in range(N_LAYERS):
        wq = nrm(next(keys), (HIDDEN, HIDDEN))
        wk = nrm(next(keys), (HIDDEN, HIDDEN))
        wv = nrm(next(keys), (HIDDEN, HIDDEN))
        wo = nrm(next(keys), (HIDDEN, HIDDEN))
        w1 = nrm(next(keys), (HIDDEN, INTER))
        w2 = nrm(next(keys), (INTER, HIDDEN))

        # attention scale 1/sqrt(head_dim) folded into the Q projection (weights + bias)
        wqkv = jnp.concatenate([wq * ATT_SCALE, wk, wv], axis=1)      # (H, 3H)
        bqkv = jnp.zeros((3 * HIDDEN,), jnp.float32)                  # (Q segment pre-scaled)

        wmat = jnp.zeros((HP, W_COLS), jnp.float32)
        wmat = wmat.at[:HIDDEN, C_W1:C_W1 + INTER].set(w1)
        wmat = wmat.at[:INTER, C_W2:C_W2 + HIDDEN].set(w2)
        wmat = wmat.at[:HIDDEN, C_WO:C_WO + HIDDEN].set(wo)
        wmat = wmat.at[:HIDDEN, C_QKV:C_QKV + 3 * HIDDEN].set(wqkv)
        wslab_l.append(wmat)

        vec = jnp.zeros((8, VEC_COLS), jnp.float32)
        vec = vec.at[0, 0:3 * HIDDEN].set(bqkv)       # row0: qkv bias
        # row1: bo (zeros)      row3: ln1 beta (zeros)
        # row4: ffn b1 (zeros)  row5: ffn b2 (zeros)   row7: ln2 beta (zeros)
        vec = vec.at[2, :HIDDEN].set(1.0)             # row2: ln1 gamma
        vec = vec.at[6, :HIDDEN].set(1.0)             # row6: ln2 gamma
        vecs_l.append(vec)

    return {
        "word_emb": word_emb,                             # (VOCAB, HP) f32
        "pos_emb": pos_emb,                               # (MAX_POS, HP) f32
        "type_emb": type_emb,                             # (2, HP) f32
        "embln": embln,                                   # (2, HP) f32
        "wslab": jnp.stack(wslab_l).astype(jnp.bfloat16),  # (L, HP, 576) bf16
        "vecs": jnp.stack(vecs_l),                        # (L, 8, 256) f32
    }


if __name__ == "__main__":
    key = jax.random.PRNGKey(0)
    k_param, k_ids = jax.random.split(key)
    params = init_params(k_param)

    input_ids = jax.random.randint(k_ids, (BATCH, SEQ), 0, VOCAB, dtype=jnp.int32)
    attention_masks = jnp.ones((BATCH, SEQ), jnp.int32).at[1, 6:].set(0)  # pad tail of 2nd seq

    cls = jax.jit(bert_forward)(params, input_ids, attention_masks)
    cls = jax.block_until_ready(cls)
    assert cls.shape == (BATCH, HIDDEN)
    assert bool(jnp.all(jnp.isfinite(cls)))
    print("KERNEL_OK")
</pallas_src>

<mosaic_0001>
module attributes {stable_mosaic.version = 11 : i64} {
  func.func @bert_encoder_kernel(%arg0: memref<2x16x128xf32, #tpu.memory_space<vmem>>, %arg1: memref<2x128xf32, #tpu.memory_space<vmem>>, %arg2: memref<2x128x576xbf16, #tpu.memory_space<vmem>>, %arg3: memref<2x8x256xf32, #tpu.memory_space<vmem>>, %arg4: memref<2x8x128xf32, #tpu.memory_space<vmem>>) attributes {dimension_semantics = [], scalar_prefetch = 0 : i64, scratch_operands = 0 : i64, tpu.core_type = #tpu.core_type<tc>} {
    %c0 = arith.constant 0 : index
    %c0_0 = arith.constant 0 : index
    %c0_1 = arith.constant 0 : index
    %0 = vector.load %arg0[%c0, %c0_0, %c0_1] : memref<2x16x128xf32, #tpu.memory_space<vmem>>, vector<2x8x128xf32>
    %1 = vector.shape_cast %0 : vector<2x8x128xf32> to vector<16x128xf32>
    %c0_2 = arith.constant 0 : index
    %c8 = arith.constant 8 : index
    %c0_3 = arith.constant 0 : index
    %2 = vector.load %arg0[%c0_2, %c8, %c0_3] : memref<2x16x128xf32, #tpu.memory_space<vmem>>, vector<2x1x8xf32>
    %c0_4 = arith.constant 0 : index
    %c0_5 = arith.constant 0 : index
    %3 = vector.load %arg1[%c0_4, %c0_5] : memref<2x128xf32, #tpu.memory_space<vmem>>, vector<1x128xf32>
    %c1 = arith.constant 1 : index
    %c0_6 = arith.constant 0 : index
    %4 = vector.load %arg1[%c1, %c0_6] : memref<2x128xf32, #tpu.memory_space<vmem>>, vector<1x128xf32>
    %cst = arith.constant dense<0.000000e+00> : vector<16xf32>
    %5 = vector.multi_reduction <add>, %1, %cst [1] : vector<16x128xf32> to vector<16xf32>
    %6 = vector.shape_cast %5 : vector<16xf32> to vector<16x1xf32>
    %cst_7 = arith.constant 1.562500e-02 : f32
    %7 = vector.broadcast %cst_7 : f32 to vector<16x1xf32>
    %8 = arith.mulf %6, %7 : vector<16x1xf32>
    %9 = arith.mulf %1, %1 : vector<16x128xf32>
    %cst_8 = arith.constant dense<0.000000e+00> : vector<16xf32>
    %10 = vector.multi_reduction <add>, %9, %cst_8 [1] : vector<16x128xf32> to vector<16xf32>
    %11 = vector.shape_cast %10 : vector<16xf32> to vector<16x1xf32>
    %cst_9 = arith.constant 1.562500e-02 : f32
    %12 = vector.broadcast %cst_9 : f32 to vector<16x1xf32>
    %13 = arith.mulf %11, %12 : vector<16x1xf32>
    %14 = arith.mulf %8, %8 : vector<16x1xf32>
    %15 = arith.subf %13, %14 : vector<16x1xf32>
    %16 = vector.broadcast %8 : vector<16x1xf32> to vector<16x128xf32>
    %17 = arith.subf %1, %16 : vector<16x128xf32>
    %cst_10 = arith.constant 9.99999996E-13 : f32
    %18 = vector.broadcast %cst_10 : f32 to vector<16x1xf32>
    %19 = arith.addf %15, %18 : vector<16x1xf32>
    %20 = math.rsqrt %19 : vector<16x1xf32>
    %21 = vector.broadcast %20 : vector<16x1xf32> to vector<16x128xf32>
    %22 = arith.mulf %17, %21 : vector<16x128xf32>
    %23 = vector.broadcast %3 : vector<1x128xf32> to vector<16x128xf32>
    %24 = arith.mulf %22, %23 : vector<16x128xf32>
    %25 = vector.broadcast %4 : vector<1x128xf32> to vector<16x128xf32>
    %26 = arith.addf %24, %25 : vector<16x128xf32>
    %c0_11 = arith.constant 0 : index
    %c0_12 = arith.constant 0 : index
    %c0_13 = arith.constant 0 : index
    %27 = vector.load %arg2[%c0_11, %c0_12, %c0_13] : memref<2x128x576xbf16, #tpu.memory_space<vmem>>, vector<1x128x128xbf16>
    %28 = vector.shape_cast %27 : vector<1x128x128xbf16> to vector<128x128xbf16>
    %c0_14 = arith.constant 0 : index
    %c0_15 = arith.constant 0 : index
    %c128 = arith.constant 128 : index
    %29 = vector.load %arg2[%c0_14, %c0_15, %c128] : memref<2x128x576xbf16, #tpu.memory_space<vmem>>, vector<1x128x128xbf16>
    %30 = vector.shape_cast %29 : vector<1x128x128xbf16> to vector<128x128xbf16>
    %c0_16 = arith.constant 0 : index
    %c0_17 = arith.constant 0 : index
    %c256 = arith.constant 256 : index
    %31 = vector.load %arg2[%c0_16, %c0_17, %c256] : memref<2x128x576xbf16, #tpu.memory_space<vmem>>, vector<1x64x128xbf16>
    %32 = vector.shape_cast %31 : vector<1x64x128xbf16> to vector<64x128xbf16>
    %c0_18 = arith.constant 0 : index
    %c0_19 = arith.constant 0 : index
    %c384 = arith.constant 384 : index
    %33 = vector.load %arg2[%c0_18, %c0_19, %c384] : memref<2x128x576xbf16, #tpu.memory_space<vmem>>, vector<1x128x192xbf16>
    %34 = vector.shape_cast %33 : vector<1x128x192xbf16> to vector<128x192xbf16>
    %c0_20 = arith.constant 0 : index
    %c0_21 = arith.constant 0 : index
    %c0_22 = arith.constant 0 : index
    %35 = vector.load %arg3[%c0_20, %c0_21, %c0_22] : memref<2x8x256xf32, #tpu.memory_space<vmem>>, vector<1x1x192xf32>
    %36 = vector.shape_cast %35 : vector<1x1x192xf32> to vector<1x192xf32>
    %c0_23 = arith.constant 0 : index
    %c1_24 = arith.constant 1 : index
    %c0_25 = arith.constant 0 : index
    %37 = vector.load %arg3[%c0_23, %c1_24, %c0_25] : memref<2x8x256xf32, #tpu.memory_space<vmem>>, vector<1x1x128xf32>
    %38 = vector.shape_cast %37 : vector<1x1x128xf32> to vector<1x128xf32>
    %c0_26 = arith.constant 0 : index
    %c2 = arith.constant 2 : index
    %c0_27 = arith.constant 0 : index
    %39 = vector.load %arg3[%c0_26, %c2, %c0_27] : memref<2x8x256xf32, #tpu.memory_space<vmem>>, vector<1x1x128xf32>
    %40 = vector.shape_cast %39 : vector<1x1x128xf32> to vector<1x128xf32>
    %c0_28 = arith.constant 0 : index
    %c3 = arith.constant 3 : index
    %c0_29 = arith.constant 0 : index
    %41 = vector.load %arg3[%c0_28, %c3, %c0_29] : memref<2x8x256xf32, #tpu.memory_space<vmem>>, vector<1x1x128xf32>
    %42 = vector.shape_cast %41 : vector<1x1x128xf32> to vector<1x128xf32>
    %c0_30 = arith.constant 0 : index
    %c4 = arith.constant 4 : index
    %c0_31 = arith.constant 0 : index
    %43 = vector.load %arg3[%c0_30, %c4, %c0_31] : memref<2x8x256xf32, #tpu.memory_space<vmem>>, vector<1x1x128xf32>
    %44 = vector.shape_cast %43 : vector<1x1x128xf32> to vector<1x128xf32>
    %c0_32 = arith.constant 0 : index
    %c5 = arith.constant 5 : index
    %c0_33 = arith.constant 0 : index
    %45 = vector.load %arg3[%c0_32, %c5, %c0_33] : memref<2x8x256xf32, #tpu.memory_space<vmem>>, vector<1x1x128xf32>
    %46 = vector.shape_cast %45 : vector<1x1x128xf32> to vector<1x128xf32>
    %c0_34 = arith.constant 0 : index
    %c6 = arith.constant 6 : index
    %c0_35 = arith.constant 0 : index
    %47 = vector.load %arg3[%c0_34, %c6, %c0_35] : memref<2x8x256xf32, #tpu.memory_space<vmem>>, vector<1x1x128xf32>
    %48 = vector.shape_cast %47 : vector<1x1x128xf32> to vector<1x128xf32>
    %c0_36 = arith.constant 0 : index
    %c7 = arith.constant 7 : index
    %c0_37 = arith.constant 0 : index
    %49 = vector.load %arg3[%c0_36, %c7, %c0_37] : memref<2x8x256xf32, #tpu.memory_space<vmem>>, vector<1x1x128xf32>
    %50 = vector.shape_cast %49 : vector<1x1x128xf32> to vector<1x128xf32>
    %51 = arith.truncf %26 : vector<16x128xf32> to vector<16x128xbf16>
    %cst_38 = arith.constant dense<0.000000e+00> : vector<16x192xf32>
    %52 = tpu.matmul %51, %34, %cst_38 {dimension_numbers = #tpu.dot_dimension_numbers<[1], [0], [0], [1], [0, 0, 1, 1], [], []>} : vector<16x128xbf16>, vector<128x192xbf16>, vector<16x192xf32> -> vector<16x192xf32>
    %53 = vector.broadcast %36 : vector<1x192xf32> to vector<16x192xf32>
    %54 = arith.addf %52, %53 : vector<16x192xf32>
    %55 = vector.extract_strided_slice %54 {offsets = [0, 0], sizes = [16, 16], strides = [1, 1]} : vector<16x192xf32> to vector<16x16xf32>
    %56 = vector.shape_cast %55 : vector<16x16xf32> to vector<2x8x16xf32>
    %57 = vector.extract_strided_slice %54 {offsets = [0, 64], sizes = [16, 16], strides = [1, 1]} : vector<16x192xf32> to vector<16x16xf32>
    %58 = vector.shape_cast %57 : vector<16x16xf32> to vector<2x8x16xf32>
    %59 = vector.extract_strided_slice %54 {offsets = [0, 128], sizes = [16, 16], strides = [1, 1]} : vector<16x192xf32> to vector<16x16xf32>
    %60 = vector.shape_cast %59 : vector<16x16xf32> to vector<2x8x16xf32>
    %61 = arith.truncf %56 : vector<2x8x16xf32> to vector<2x8x16xbf16>
    %62 = arith.truncf %58 : vector<2x8x16xf32> to vector<2x8x16xbf16>
    "tpu.trace_start"() <{level = 10 : i32, message = "bqd,bkd->bqk"}> : () -> ()
    %cst_39 = arith.constant dense<0.000000e+00> : vector<2x8x8xf32>
    %63 = tpu.matmul %61, %62, %cst_39 {dimension_numbers = #tpu.dot_dimension_numbers<[2], [2], [1], [1], [0, 0, 0, 1, 1, 1], [0], [0]>} : vector<2x8x16xbf16>, vector<2x8x16xbf16>, vector<2x8x8xf32> -> vector<2x8x8xf32>
    "tpu.trace_stop"() : () -> ()
    %64 = vector.broadcast %2 : vector<2x1x8xf32> to vector<2x8x8xf32>
    %65 = arith.addf %63, %64 : vector<2x8x8xf32>
    %cst_40 = arith.constant dense<0xFF800000> : vector<2x8xf32>
    %66 = vector.multi_reduction <maximumf>, %65, %cst_40 [2] : vector<2x8x8xf32> to vector<2x8xf32>
    %67 = vector.shape_cast %66 : vector<2x8xf32> to vector<2x8x1xf32>
    %68 = vector.broadcast %67 : vector<2x8x1xf32> to vector<2x8x8xf32>
    %69 = arith.subf %65, %68 : vector<2x8x8xf32>
    %70 = math.exp %69 : vector<2x8x8xf32>
    %cst_41 = arith.constant dense<0.000000e+00> : vector<2x8xf32>
    %71 = vector.multi_reduction <add>, %70, %cst_41 [2] : vector<2x8x8xf32> to vector<2x8xf32>
    %72 = vector.shape_cast %71 : vector<2x8xf32> to vector<2x8x1xf32>
    %73 = tpu.reciprocal %72 {approx = true} : vector<2x8x1xf32> -> vector<2x8x1xf32>
    %74 = vector.broadcast %73 : vector<2x8x1xf32> to vector<2x8x8xf32>
    %75 = arith.mulf %70, %74 : vector<2x8x8xf32>
    %76 = arith.truncf %75 : vector<2x8x8xf32> to vector<2x8x8xbf16>
    %77 = arith.truncf %60 : vector<2x8x16xf32> to vector<2x8x16xbf16>
    "tpu.trace_start"() <{level = 10 : i32, message = "bqk,bkd->bqd"}> : () -> ()
    %cst_42 = arith.constant dense<0.000000e+00> : vector<2x8x16xf32>
    %78 = tpu.matmul %76, %77, %cst_42 {dimension_numbers = #tpu.dot_dimension_numbers<[2], [1], [1], [2], [0, 0, 0, 1, 1, 2], [0], [0]>} : vector<2x8x8xbf16>, vector<2x8x16xbf16>, vector<2x8x16xf32> -> vector<2x8x16xf32>
    "tpu.trace_stop"() : () -> ()
    %79 = vector.extract_strided_slice %54 {offsets = [0, 16], sizes = [16, 16], strides = [1, 1]} : vector<16x192xf32> to vector<16x16xf32>
    %80 = vector.shape_cast %79 : vector<16x16xf32> to vector<2x8x16xf32>
    %81 = vector.extract_strided_slice %54 {offsets = [0, 80], sizes = [16, 16], strides = [1, 1]} : vector<16x192xf32> to vector<16x16xf32>
    %82 = vector.shape_cast %81 : vector<16x16xf32> to vector<2x8x16xf32>
    %83 = vector.extract_strided_slice %54 {offsets = [0, 144], sizes = [16, 16], strides = [1, 1]} : vector<16x192xf32> to vector<16x16xf32>
    %84 = vector.shape_cast %83 : vector<16x16xf32> to vector<2x8x16xf32>
    %85 = arith.truncf %80 : vector<2x8x16xf32> to vector<2x8x16xbf16>
    %86 = arith.truncf %82 : vector<2x8x16xf32> to vector<2x8x16xbf16>
    "tpu.trace_start"() <{level = 10 : i32, message = "bqd,bkd->bqk"}> : () -> ()
    %cst_43 = arith.constant dense<0.000000e+00> : vector<2x8x8xf32>
    %87 = tpu.matmul %85, %86, %cst_43 {dimension_numbers = #tpu.dot_dimension_numbers<[2], [2], [1], [1], [0, 0, 0, 1, 1, 1], [0], [0]>} : vector<2x8x16xbf16>, vector<2x8x16xbf16>, vector<2x8x8xf32> -> vector<2x8x8xf32>
    "tpu.trace_stop"() : () -> ()
    %88 = vector.broadcast %2 : vector<2x1x8xf32> to vector<2x8x8xf32>
    %89 = arith.addf %87, %88 : vector<2x8x8xf32>
    %cst_44 = arith.constant dense<0xFF800000> : vector<2x8xf32>
    %90 = vector.multi_reduction <maximumf>, %89, %cst_44 [2] : vector<2x8x8xf32> to vector<2x8xf32>
    %91 = vector.shape_cast %90 : vector<2x8xf32> to vector<2x8x1xf32>
    %92 = vector.broadcast %91 : vector<2x8x1xf32> to vector<2x8x8xf32>
    %93 = arith.subf %89, %92 : vector<2x8x8xf32>
    %94 = math.exp %93 : vector<2x8x8xf32>
    %cst_45 = arith.constant dense<0.000000e+00> : vector<2x8xf32>
    %95 = vector.multi_reduction <add>, %94, %cst_45 [2] : vector<2x8x8xf32> to vector<2x8xf32>
    %96 = vector.shape_cast %95 : vector<2x8xf32> to vector<2x8x1xf32>
    %97 = tpu.reciprocal %96 {approx = true} : vector<2x8x1xf32> -> vector<2x8x1xf32>
    %98 = vector.broadcast %97 : vector<2x8x1xf32> to vector<2x8x8xf32>
    %99 = arith.mulf %94, %98 : vector<2x8x8xf32>
    %100 = arith.truncf %99 : vector<2x8x8xf32> to vector<2x8x8xbf16>
    %101 = arith.truncf %84 : vector<2x8x16xf32> to vector<2x8x16xbf16>
    "tpu.trace_start"() <{level = 10 : i32, message = "bqk,bkd->bqd"}> : () -> ()
    %cst_46 = arith.constant dense<0.000000e+00> : vector<2x8x16xf32>
    %102 = tpu.matmul %100, %101, %cst_46 {dimension_numbers = #tpu.dot_dimension_numbers<[2], [1], [1], [2], [0, 0, 0, 1, 1, 2], [0], [0]>} : vector<2x8x8xbf16>, vector<2x8x16xbf16>, vector<2x8x16xf32> -> vector<2x8x16xf32>
    "tpu.trace_stop"() : () -> ()
    %103 = vector.extract_strided_slice %54 {offsets = [0, 32], sizes = [16, 16], strides = [1, 1]} : vector<16x192xf32> to vector<16x16xf32>
    %104 = vector.shape_cast %103 : vector<16x16xf32> to vector<2x8x16xf32>
    %105 = vector.extract_strided_slice %54 {offsets = [0, 96], sizes = [16, 16], strides = [1, 1]} : vector<16x192xf32> to vector<16x16xf32>
    %106 = vector.shape_cast %105 : vector<16x16xf32> to vector<2x8x16xf32>
    %107 = vector.extract_strided_slice %54 {offsets = [0, 160], sizes = [16, 16], strides = [1, 1]} : vector<16x192xf32> to vector<16x16xf32>
    %108 = vector.shape_cast %107 : vector<16x16xf32> to vector<2x8x16xf32>
    %109 = arith.truncf %104 : vector<2x8x16xf32> to vector<2x8x16xbf16>
    %110 = arith.truncf %106 : vector<2x8x16xf32> to vector<2x8x16xbf16>
    "tpu.trace_start"() <{level = 10 : i32, message = "bqd,bkd->bqk"}> : () -> ()
    %cst_47 = arith.constant dense<0.000000e+00> : vector<2x8x8xf32>
    %111 = tpu.matmul %109, %110, %cst_47 {dimension_numbers = #tpu.dot_dimension_numbers<[2], [2], [1], [1], [0, 0, 0, 1, 1, 1], [0], [0]>} : vector<2x8x16xbf16>, vector<2x8x16xbf16>, vector<2x8x8xf32> -> vector<2x8x8xf32>
    "tpu.trace_stop"() : () -> ()
    %112 = vector.broadcast %2 : vector<2x1x8xf32> to vector<2x8x8xf32>
    %113 = arith.addf %111, %112 : vector<2x8x8xf32>
    %cst_48 = arith.constant dense<0xFF800000> : vector<2x8xf32>
    %114 = vector.multi_reduction <maximumf>, %113, %cst_48 [2] : vector<2x8x8xf32> to vector<2x8xf32>
    %115 = vector.shape_cast %114 : vector<2x8xf32> to vector<2x8x1xf32>
    %116 = vector.broadcast %115 : vector<2x8x1xf32> to vector<2x8x8xf32>
    %117 = arith.subf %113, %116 : vector<2x8x8xf32>
    %118 = math.exp %117 : vector<2x8x8xf32>
    %cst_49 = arith.constant dense<0.000000e+00> : vector<2x8xf32>
    %119 = vector.multi_reduction <add>, %118, %cst_49 [2] : vector<2x8x8xf32> to vector<2x8xf32>
    %120 = vector.shape_cast %119 : vector<2x8xf32> to vector<2x8x1xf32>
    %121 = tpu.reciprocal %120 {approx = true} : vector<2x8x1xf32> -> vector<2x8x1xf32>
    %122 = vector.broadcast %121 : vector<2x8x1xf32> to vector<2x8x8xf32>
    %123 = arith.mulf %118, %122 : vector<2x8x8xf32>
    %124 = arith.truncf %123 : vector<2x8x8xf32> to vector<2x8x8xbf16>
    %125 = arith.truncf %108 : vector<2x8x16xf32> to vector<2x8x16xbf16>
    "tpu.trace_start"() <{level = 10 : i32, message = "bqk,bkd->bqd"}> : () -> ()
    %cst_50 = arith.constant dense<0.000000e+00> : vector<2x8x16xf32>
    %126 = tpu.matmul %124, %125, %cst_50 {dimension_numbers = #tpu.dot_dimension_numbers<[2], [1], [1], [2], [0, 0, 0, 1, 1, 2], [0], [0]>} : vector<2x8x8xbf16>, vector<2x8x16xbf16>, vector<2x8x16xf32> -> vector<2x8x16xf32>
    "tpu.trace_stop"() : () -> ()
    %127 = vector.extract_strided_slice %54 {offsets = [0, 48], sizes = [16, 16], strides = [1, 1]} : vector<16x192xf32> to vector<16x16xf32>
    %128 = vector.shape_cast %127 : vector<16x16xf32> to vector<2x8x16xf32>
    %129 = vector.extract_strided_slice %54 {offsets = [0, 112], sizes = [16, 16], strides = [1, 1]} : vector<16x192xf32> to vector<16x16xf32>
    %130 = vector.shape_cast %129 : vector<16x16xf32> to vector<2x8x16xf32>
    %131 = vector.extract_strided_slice %54 {offsets = [0, 176], sizes = [16, 16], strides = [1, 1]} : vector<16x192xf32> to vector<16x16xf32>
    %132 = vector.shape_cast %131 : vector<16x16xf32> to vector<2x8x16xf32>
    %133 = arith.truncf %128 : vector<2x8x16xf32> to vector<2x8x16xbf16>
    %134 = arith.truncf %130 : vector<2x8x16xf32> to vector<2x8x16xbf16>
    "tpu.trace_start"() <{level = 10 : i32, message = "bqd,bkd->bqk"}> : () -> ()
    %cst_51 = arith.constant dense<0.000000e+00> : vector<2x8x8xf32>
    %135 = tpu.matmul %133, %134, %cst_51 {dimension_numbers = #tpu.dot_dimension_numbers<[2], [2], [1], [1], [0, 0, 0, 1, 1, 1], [0], [0]>} : vector<2x8x16xbf16>, vector<2x8x16xbf16>, vector<2x8x8xf32> -> vector<2x8x8xf32>
    "tpu.trace_stop"() : () -> ()
    %136 = vector.broadcast %2 : vector<2x1x8xf32> to vector<2x8x8xf32>
    %137 = arith.addf %135, %136 : vector<2x8x8xf32>
    %cst_52 = arith.constant dense<0xFF800000> : vector<2x8xf32>
    %138 = vector.multi_reduction <maximumf>, %137, %cst_52 [2] : vector<2x8x8xf32> to vector<2x8xf32>
    %139 = vector.shape_cast %138 : vector<2x8xf32> to vector<2x8x1xf32>
    %140 = vector.broadcast %139 : vector<2x8x1xf32> to vector<2x8x8xf32>
    %141 = arith.subf %137, %140 : vector<2x8x8xf32>
    %142 = math.exp %141 : vector<2x8x8xf32>
    %cst_53 = arith.constant dense<0.000000e+00> : vector<2x8xf32>
    %143 = vector.multi_reduction <add>, %142, %cst_53 [2] : vector<2x8x8xf32> to vector<2x8xf32>
    %144 = vector.shape_cast %143 : vector<2x8xf32> to vector<2x8x1xf32>
    %145 = tpu.reciprocal %144 {approx = true} : vector<2x8x1xf32> -> vector<2x8x1xf32>
    %146 = vector.broadcast %145 : vector<2x8x1xf32> to vector<2x8x8xf32>
    %147 = arith.mulf %142, %146 : vector<2x8x8xf32>
    %148 = arith.truncf %147 : vector<2x8x8xf32> to vector<2x8x8xbf16>
    %149 = arith.truncf %132 : vector<2x8x16xf32> to vector<2x8x16xbf16>
    "tpu.trace_start"() <{level = 10 : i32, message = "bqk,bkd->bqd"}> : () -> ()
    %cst_54 = arith.constant dense<0.000000e+00> : vector<2x8x16xf32>
    %150 = tpu.matmul %148, %149, %cst_54 {dimension_numbers = #tpu.dot_dimension_numbers<[2], [1], [1], [2], [0, 0, 0, 1, 1, 2], [0], [0]>} : vector<2x8x8xbf16>, vector<2x8x16xbf16>, vector<2x8x16xf32> -> vector<2x8x16xf32>
    "tpu.trace_stop"() : () -> ()
    %151 = tpu.concatenate %78, %102, %126, %150 in 2 : vector<2x8x16xf32>, vector<2x8x16xf32>, vector<2x8x16xf32>, vector<2x8x16xf32> -> vector<2x8x64xf32>
    %152 = vector.shape_cast %151 : vector<2x8x64xf32> to vector<16x64xf32>
    %153 = arith.truncf %152 : vector<16x64xf32> to vector<16x64xbf16>
    %cst_55 = arith.constant dense<0.000000e+00> : vector<16x128xf32>
    %154 = tpu.matmul %153, %32, %cst_55 {dimension_numbers = #tpu.dot_dimension_numbers<[1], [0], [0], [1], [0, 0, 1, 1], [], []>} : vector<16x64xbf16>, vector<64x128xbf16>, vector<16x128xf32> -> vector<16x128xf32>
    %155 = vector.broadcast %38 : vector<1x128xf32> to vector<16x128xf32>
    %156 = arith.addf %154, %155 : vector<16x128xf32>
    %157 = arith.addf %26, %156 : vector<16x128xf32>
    %cst_56 = arith.constant dense<0.000000e+00> : vector<16xf32>
    %158 = vector.multi_reduction <add>, %157, %cst_56 [1] : vector<16x128xf32> to vector<16xf32>
    %159 = vector.shape_cast %158 : vector<16xf32> to vector<16x1xf32>
    %cst_57 = arith.constant 1.562500e-02 : f32
    %160 = vector.broadcast %cst_57 : f32 to vector<16x1xf32>
    %161 = arith.mulf %159, %160 : vector<16x1xf32>
    %162 = arith.mulf %157, %157 : vector<16x128xf32>
    %cst_58 = arith.constant dense<0.000000e+00> : vector<16xf32>
    %163 = vector.multi_reduction <add>, %162, %cst_58 [1] : vector<16x128xf32> to vector<16xf32>
    %164 = vector.shape_cast %163 : vector<16xf32> to vector<16x1xf32>
    %cst_59 = arith.constant 1.562500e-02 : f32
    %165 = vector.broadcast %cst_59 : f32 to vector<16x1xf32>
    %166 = arith.mulf %164, %165 : vector<16x1xf32>
    %167 = arith.mulf %161, %161 : vector<16x1xf32>
    %168 = arith.subf %166, %167 : vector<16x1xf32>
    %169 = vector.broadcast %161 : vector<16x1xf32> to vector<16x128xf32>
    %170 = arith.subf %157, %169 : vector<16x128xf32>
    %cst_60 = arith.constant 9.99999996E-13 : f32
    %171 = vector.broadcast %cst_60 : f32 to vector<16x1xf32>
    %172 = arith.addf %168, %171 : vector<16x1xf32>
    %173 = math.rsqrt %172 : vector<16x1xf32>
    %174 = vector.broadcast %173 : vector<16x1xf32> to vector<16x128xf32>
    %175 = arith.mulf %170, %174 : vector<16x128xf32>
    %176 = vector.broadcast %40 : vector<1x128xf32> to vector<16x128xf32>
    %177 = arith.mulf %175, %176 : vector<16x128xf32>
    %178 = vector.broadcast %42 : vector<1x128xf32> to vector<16x128xf32>
    %179 = arith.addf %177, %178 : vector<16x128xf32>
    %180 = arith.truncf %179 : vector<16x128xf32> to vector<16x128xbf16>
    %cst_61 = arith.constant dense<0.000000e+00> : vector<16x128xf32>
    %181 = tpu.matmul %180, %28, %cst_61 {dimension_numbers = #tpu.dot_dimension_numbers<[1], [0], [0], [1], [0, 0, 1, 1], [], []>} : vector<16x128xbf16>, vector<128x128xbf16>, vector<16x128xf32> -> vector<16x128xf32>
    %182 = vector.broadcast %44 : vector<1x128xf32> to vector<16x128xf32>
    %183 = arith.addf %181, %182 : vector<16x128xf32>
    %184 = arith.mulf %183, %183 : vector<16x128xf32>
    %185 = arith.mulf %183, %184 : vector<16x128xf32>
    %cst_62 = arith.constant 4.471500e-02 : f32
    %186 = vector.broadcast %cst_62 : f32 to vector<16x128xf32>
    %187 = arith.mulf %186, %185 : vector<16x128xf32>
    %188 = arith.addf %183, %187 : vector<16x128xf32>
    %cst_63 = arith.constant 0.797884583 : f32
    %189 = vector.broadcast %cst_63 : f32 to vector<16x128xf32>
    %190 = arith.mulf %189, %188 : vector<16x128xf32>
    %191 = math.tanh %190 : vector<16x128xf32>
    %cst_64 = arith.constant 1.000000e+00 : f32
    %192 = vector.broadcast %cst_64 : f32 to vector<16x128xf32>
    %193 = arith.addf %192, %191 : vector<16x128xf32>
    %cst_65 = arith.constant 5.000000e-01 : f32
    %194 = vector.broadcast %cst_65 : f32 to vector<16x128xf32>
    %195 = arith.mulf %194, %193 : vector<16x128xf32>
    %196 = arith.mulf %183, %195 : vector<16x128xf32>
    %197 = arith.truncf %196 : vector<16x128xf32> to vector<16x128xbf16>
    %cst_66 = arith.constant dense<0.000000e+00> : vector<16x128xf32>
    %198 = tpu.matmul %197, %30, %cst_66 {dimension_numbers = #tpu.dot_dimension_numbers<[1], [0], [0], [1], [0, 0, 1, 1], [], []>} : vector<16x128xbf16>, vector<128x128xbf16>, vector<16x128xf32> -> vector<16x128xf32>
    %199 = vector.broadcast %46 : vector<1x128xf32> to vector<16x128xf32>
    %200 = arith.addf %198, %199 : vector<16x128xf32>
    %201 = arith.addf %179, %200 : vector<16x128xf32>
    %cst_67 = arith.constant dense<0.000000e+00> : vector<16xf32>
    %202 = vector.multi_reduction <add>, %201, %cst_67 [1] : vector<16x128xf32> to vector<16xf32>
    %203 = vector.shape_cast %202 : vector<16xf32> to vector<16x1xf32>
    %cst_68 = arith.constant 1.562500e-02 : f32
    %204 = vector.broadcast %cst_68 : f32 to vector<16x1xf32>
    %205 = arith.mulf %203, %204 : vector<16x1xf32>
    %206 = arith.mulf %201, %201 : vector<16x128xf32>
    %cst_69 = arith.constant dense<0.000000e+00> : vector<16xf32>
    %207 = vector.multi_reduction <add>, %206, %cst_69 [1] : vector<16x128xf32> to vector<16xf32>
    %208 = vector.shape_cast %207 : vector<16xf32> to vector<16x1xf32>
    %cst_70 = arith.constant 1.562500e-02 : f32
    %209 = vector.broadcast %cst_70 : f32 to vector<16x1xf32>
    %210 = arith.mulf %208, %209 : vector<16x1xf32>
    %211 = arith.mulf %205, %205 : vector<16x1xf32>
    %212 = arith.subf %210, %211 : vector<16x1xf32>
    %213 = vector.broadcast %205 : vector<16x1xf32> to vector<16x128xf32>
    %214 = arith.subf %201, %213 : vector<16x128xf32>
    %cst_71 = arith.constant 9.99999996E-13 : f32
    %215 = vector.broadcast %cst_71 : f32 to vector<16x1xf32>
    %216 = arith.addf %212, %215 : vector<16x1xf32>
    %217 = math.rsqrt %216 : vector<16x1xf32>
    %218 = vector.broadcast %217 : vector<16x1xf32> to vector<16x128xf32>
    %219 = arith.mulf %214, %218 : vector<16x128xf32>
    %220 = vector.broadcast %48 : vector<1x128xf32> to vector<16x128xf32>
    %221 = arith.mulf %219, %220 : vector<16x128xf32>
    %222 = vector.broadcast %50 : vector<1x128xf32> to vector<16x128xf32>
    %223 = arith.addf %221, %222 : vector<16x128xf32>
    %c1_72 = arith.constant 1 : index
    %c0_73 = arith.constant 0 : index
    %c0_74 = arith.constant 0 : index
    %224 = vector.load %arg2[%c1_72, %c0_73, %c0_74] : memref<2x128x576xbf16, #tpu.memory_space<vmem>>, vector<1x128x128xbf16>
    %225 = vector.shape_cast %224 : vector<1x128x128xbf16> to vector<128x128xbf16>
    %c1_75 = arith.constant 1 : index
    %c0_76 = arith.constant 0 : index
    %c128_77 = arith.constant 128 : index
    %226 = vector.load %arg2[%c1_75, %c0_76, %c128_77] : memref<2x128x576xbf16, #tpu.memory_space<vmem>>, vector<1x128x128xbf16>
    %227 = vector.shape_cast %226 : vector<1x128x128xbf16> to vector<128x128xbf16>
    %c1_78 = arith.constant 1 : index
    %c0_79 = arith.constant 0 : index
    %c256_80 = arith.constant 256 : index
    %228 = vector.load %arg2[%c1_78, %c0_79, %c256_80] : memref<2x128x576xbf16, #tpu.memory_space<vmem>>, vector<1x64x128xbf16>
    %229 = vector.shape_cast %228 : vector<1x64x128xbf16> to vector<64x128xbf16>
    %c1_81 = arith.constant 1 : index
    %c0_82 = arith.constant 0 : index
    %c384_83 = arith.constant 384 : index
    %230 = vector.load %arg2[%c1_81, %c0_82, %c384_83] : memref<2x128x576xbf16, #tpu.memory_space<vmem>>, vector<1x128x192xbf16>
    %231 = vector.shape_cast %230 : vector<1x128x192xbf16> to vector<128x192xbf16>
    %c1_84 = arith.constant 1 : index
    %c0_85 = arith.constant 0 : index
    %c0_86 = arith.constant 0 : index
    %232 = vector.load %arg3[%c1_84, %c0_85, %c0_86] : memref<2x8x256xf32, #tpu.memory_space<vmem>>, vector<1x1x192xf32>
    %233 = vector.shape_cast %232 : vector<1x1x192xf32> to vector<1x192xf32>
    %c1_87 = arith.constant 1 : index
    %c1_88 = arith.constant 1 : index
    %c0_89 = arith.constant 0 : index
    %234 = vector.load %arg3[%c1_87, %c1_88, %c0_89] : memref<2x8x256xf32, #tpu.memory_space<vmem>>, vector<1x1x128xf32>
    %235 = vector.shape_cast %234 : vector<1x1x128xf32> to vector<1x128xf32>
    %c1_90 = arith.constant 1 : index
    %c2_91 = arith.constant 2 : index
    %c0_92 = arith.constant 0 : index
    %236 = vector.load %arg3[%c1_90, %c2_91, %c0_92] : memref<2x8x256xf32, #tpu.memory_space<vmem>>, vector<1x1x128xf32>
    %237 = vector.shape_cast %236 : vector<1x1x128xf32> to vector<1x128xf32>
    %c1_93 = arith.constant 1 : index
    %c3_94 = arith.constant 3 : index
    %c0_95 = arith.constant 0 : index
    %238 = vector.load %arg3[%c1_93, %c3_94, %c0_95] : memref<2x8x256xf32, #tpu.memory_space<vmem>>, vector<1x1x128xf32>
    %239 = vector.shape_cast %238 : vector<1x1x128xf32> to vector<1x128xf32>
    %c1_96 = arith.constant 1 : index
    %c4_97 = arith.constant 4 : index
    %c0_98 = arith.constant 0 : index
    %240 = vector.load %arg3[%c1_96, %c4_97, %c0_98] : memref<2x8x256xf32, #tpu.memory_space<vmem>>, vector<1x1x128xf32>
    %241 = vector.shape_cast %240 : vector<1x1x128xf32> to vector<1x128xf32>
    %c1_99 = arith.constant 1 : index
    %c5_100 = arith.constant 5 : index
    %c0_101 = arith.constant 0 : index
    %242 = vector.load %arg3[%c1_99, %c5_100, %c0_101] : memref<2x8x256xf32, #tpu.memory_space<vmem>>, vector<1x1x128xf32>
    %243 = vector.shape_cast %242 : vector<1x1x128xf32> to vector<1x128xf32>
    %c1_102 = arith.constant 1 : index
    %c6_103 = arith.constant 6 : index
    %c0_104 = arith.constant 0 : index
    %244 = vector.load %arg3[%c1_102, %c6_103, %c0_104] : memref<2x8x256xf32, #tpu.memory_space<vmem>>, vector<1x1x128xf32>
    %245 = vector.shape_cast %244 : vector<1x1x128xf32> to vector<1x128xf32>
    %c1_105 = arith.constant 1 : index
    %c7_106 = arith.constant 7 : index
    %c0_107 = arith.constant 0 : index
    %246 = vector.load %arg3[%c1_105, %c7_106, %c0_107] : memref<2x8x256xf32, #tpu.memory_space<vmem>>, vector<1x1x128xf32>
    %247 = vector.shape_cast %246 : vector<1x1x128xf32> to vector<1x128xf32>
    %248 = arith.truncf %223 : vector<16x128xf32> to vector<16x128xbf16>
    %cst_108 = arith.constant dense<0.000000e+00> : vector<16x192xf32>
    %249 = tpu.matmul %248, %231, %cst_108 {dimension_numbers = #tpu.dot_dimension_numbers<[1], [0], [0], [1], [0, 0, 1, 1], [], []>} : vector<16x128xbf16>, vector<128x192xbf16>, vector<16x192xf32> -> vector<16x192xf32>
    %250 = vector.broadcast %233 : vector<1x192xf32> to vector<16x192xf32>
    %251 = arith.addf %249, %250 : vector<16x192xf32>
    %252 = vector.extract_strided_slice %251 {offsets = [0, 0], sizes = [16, 16], strides = [1, 1]} : vector<16x192xf32> to vector<16x16xf32>
    %253 = vector.shape_cast %252 : vector<16x16xf32> to vector<2x8x16xf32>
    %254 = vector.extract_strided_slice %251 {offsets = [0, 64], sizes = [16, 16], strides = [1, 1]} : vector<16x192xf32> to vector<16x16xf32>
    %255 = vector.shape_cast %254 : vector<16x16xf32> to vector<2x8x16xf32>
    %256 = vector.extract_strided_slice %251 {offsets = [0, 128], sizes = [16, 16], strides = [1, 1]} : vector<16x192xf32> to vector<16x16xf32>
    %257 = vector.shape_cast %256 : vector<16x16xf32> to vector<2x8x16xf32>
    %258 = arith.truncf %253 : vector<2x8x16xf32> to vector<2x8x16xbf16>
    %259 = arith.truncf %255 : vector<2x8x16xf32> to vector<2x8x16xbf16>
    "tpu.trace_start"() <{level = 10 : i32, message = "bqd,bkd->bqk"}> : () -> ()
    %cst_109 = arith.constant dense<0.000000e+00> : vector<2x8x8xf32>
    %260 = tpu.matmul %258, %259, %cst_109 {dimension_numbers = #tpu.dot_dimension_numbers<[2], [2], [1], [1], [0, 0, 0, 1, 1, 1], [0], [0]>} : vector<2x8x16xbf16>, vector<2x8x16xbf16>, vector<2x8x8xf32> -> vector<2x8x8xf32>
    "tpu.trace_stop"() : () -> ()
    %261 = vector.broadcast %2 : vector<2x1x8xf32> to vector<2x8x8xf32>
    %262 = arith.addf %260, %261 : vector<2x8x8xf32>
    %cst_110 = arith.constant dense<0xFF800000> : vector<2x8xf32>
    %263 = vector.multi_reduction <maximumf>, %262, %cst_110 [2] : vector<2x8x8xf32> to vector<2x8xf32>
    %264 = vector.shape_cast %263 : vector<2x8xf32> to vector<2x8x1xf32>
    %265 = vector.broadcast %264 : vector<2x8x1xf32> to vector<2x8x8xf32>
    %266 = arith.subf %262, %265 : vector<2x8x8xf32>
    %267 = math.exp %266 : vector<2x8x8xf32>
    %cst_111 = arith.constant dense<0.000000e+00> : vector<2x8xf32>
    %268 = vector.multi_reduction <add>, %267, %cst_111 [2] : vector<2x8x8xf32> to vector<2x8xf32>
    %269 = vector.shape_cast %268 : vector<2x8xf32> to vector<2x8x1xf32>
    %270 = tpu.reciprocal %269 {approx = true} : vector<2x8x1xf32> -> vector<2x8x1xf32>
    %271 = vector.broadcast %270 : vector<2x8x1xf32> to vector<2x8x8xf32>
    %272 = arith.mulf %267, %271 : vector<2x8x8xf32>
    %273 = arith.truncf %272 : vector<2x8x8xf32> to vector<2x8x8xbf16>
    %274 = arith.truncf %257 : vector<2x8x16xf32> to vector<2x8x16xbf16>
    "tpu.trace_start"() <{level = 10 : i32, message = "bqk,bkd->bqd"}> : () -> ()
    %cst_112 = arith.constant dense<0.000000e+00> : vector<2x8x16xf32>
    %275 = tpu.matmul %273, %274, %cst_112 {dimension_numbers = #tpu.dot_dimension_numbers<[2], [1], [1], [2], [0, 0, 0, 1, 1, 2], [0], [0]>} : vector<2x8x8xbf16>, vector<2x8x16xbf16>, vector<2x8x16xf32> -> vector<2x8x16xf32>
    "tpu.trace_stop"() : () -> ()
    %276 = vector.extract_strided_slice %251 {offsets = [0, 16], sizes = [16, 16], strides = [1, 1]} : vector<16x192xf32> to vector<16x16xf32>
    %277 = vector.shape_cast %276 : vector<16x16xf32> to vector<2x8x16xf32>
    %278 = vector.extract_strided_slice %251 {offsets = [0, 80], sizes = [16, 16], strides = [1, 1]} : vector<16x192xf32> to vector<16x16xf32>
    %279 = vector.shape_cast %278 : vector<16x16xf32> to vector<2x8x16xf32>
    %280 = vector.extract_strided_slice %251 {offsets = [0, 144], sizes = [16, 16], strides = [1, 1]} : vector<16x192xf32> to vector<16x16xf32>
    %281 = vector.shape_cast %280 : vector<16x16xf32> to vector<2x8x16xf32>
    %282 = arith.truncf %277 : vector<2x8x16xf32> to vector<2x8x16xbf16>
    %283 = arith.truncf %279 : vector<2x8x16xf32> to vector<2x8x16xbf16>
    "tpu.trace_start"() <{level = 10 : i32, message = "bqd,bkd->bqk"}> : () -> ()
    %cst_113 = arith.constant dense<0.000000e+00> : vector<2x8x8xf32>
    %284 = tpu.matmul %282, %283, %cst_113 {dimension_numbers = #tpu.dot_dimension_numbers<[2], [2], [1], [1], [0, 0, 0, 1, 1, 1], [0], [0]>} : vector<2x8x16xbf16>, vector<2x8x16xbf16>, vector<2x8x8xf32> -> vector<2x8x8xf32>
    "tpu.trace_stop"() : () -> ()
    %285 = vector.broadcast %2 : vector<2x1x8xf32> to vector<2x8x8xf32>
    %286 = arith.addf %284, %285 : vector<2x8x8xf32>
    %cst_114 = arith.constant dense<0xFF800000> : vector<2x8xf32>
    %287 = vector.multi_reduction <maximumf>, %286, %cst_114 [2] : vector<2x8x8xf32> to vector<2x8xf32>
    %288 = vector.shape_cast %287 : vector<2x8xf32> to vector<2x8x1xf32>
    %289 = vector.broadcast %288 : vector<2x8x1xf32> to vector<2x8x8xf32>
    %290 = arith.subf %286, %289 : vector<2x8x8xf32>
    %291 = math.exp %290 : vector<2x8x8xf32>
    %cst_115 = arith.constant dense<0.000000e+00> : vector<2x8xf32>
    %292 = vector.multi_reduction <add>, %291, %cst_115 [2] : vector<2x8x8xf32> to vector<2x8xf32>
    %293 = vector.shape_cast %292 : vector<2x8xf32> to vector<2x8x1xf32>
    %294 = tpu.reciprocal %293 {approx = true} : vector<2x8x1xf32> -> vector<2x8x1xf32>
    %295 = vector.broadcast %294 : vector<2x8x1xf32> to vector<2x8x8xf32>
    %296 = arith.mulf %291, %295 : vector<2x8x8xf32>
    %297 = arith.truncf %296 : vector<2x8x8xf32> to vector<2x8x8xbf16>
    %298 = arith.truncf %281 : vector<2x8x16xf32> to vector<2x8x16xbf16>
    "tpu.trace_start"() <{level = 10 : i32, message = "bqk,bkd->bqd"}> : () -> ()
    %cst_116 = arith.constant dense<0.000000e+00> : vector<2x8x16xf32>
    %299 = tpu.matmul %297, %298, %cst_116 {dimension_numbers = #tpu.dot_dimension_numbers<[2], [1], [1], [2], [0, 0, 0, 1, 1, 2], [0], [0]>} : vector<2x8x8xbf16>, vector<2x8x16xbf16>, vector<2x8x16xf32> -> vector<2x8x16xf32>
    "tpu.trace_stop"() : () -> ()
    %300 = vector.extract_strided_slice %251 {offsets = [0, 32], sizes = [16, 16], strides = [1, 1]} : vector<16x192xf32> to vector<16x16xf32>
    %301 = vector.shape_cast %300 : vector<16x16xf32> to vector<2x8x16xf32>
    %302 = vector.extract_strided_slice %251 {offsets = [0, 96], sizes = [16, 16], strides = [1, 1]} : vector<16x192xf32> to vector<16x16xf32>
    %303 = vector.shape_cast %302 : vector<16x16xf32> to vector<2x8x16xf32>
    %304 = vector.extract_strided_slice %251 {offsets = [0, 160], sizes = [16, 16], strides = [1, 1]} : vector<16x192xf32> to vector<16x16xf32>
    %305 = vector.shape_cast %304 : vector<16x16xf32> to vector<2x8x16xf32>
    %306 = arith.truncf %301 : vector<2x8x16xf32> to vector<2x8x16xbf16>
    %307 = arith.truncf %303 : vector<2x8x16xf32> to vector<2x8x16xbf16>
    "tpu.trace_start"() <{level = 10 : i32, message = "bqd,bkd->bqk"}> : () -> ()
    %cst_117 = arith.constant dense<0.000000e+00> : vector<2x8x8xf32>
    %308 = tpu.matmul %306, %307, %cst_117 {dimension_numbers = #tpu.dot_dimension_numbers<[2], [2], [1], [1], [0, 0, 0, 1, 1, 1], [0], [0]>} : vector<2x8x16xbf16>, vector<2x8x16xbf16>, vector<2x8x8xf32> -> vector<2x8x8xf32>
    "tpu.trace_stop"() : () -> ()
    %309 = vector.broadcast %2 : vector<2x1x8xf32> to vector<2x8x8xf32>
    %310 = arith.addf %308, %309 : vector<2x8x8xf32>
    %cst_118 = arith.constant dense<0xFF800000> : vector<2x8xf32>
    %311 = vector.multi_reduction <maximumf>, %310, %cst_118 [2] : vector<2x8x8xf32> to vector<2x8xf32>
    %312 = vector.shape_cast %311 : vector<2x8xf32> to vector<2x8x1xf32>
    %313 = vector.broadcast %312 : vector<2x8x1xf32> to vector<2x8x8xf32>
    %314 = arith.subf %310, %313 : vector<2x8x8xf32>
    %315 = math.exp %314 : vector<2x8x8xf32>
    %cst_119 = arith.constant dense<0.000000e+00> : vector<2x8xf32>
    %316 = vector.multi_reduction <add>, %315, %cst_119 [2] : vector<2x8x8xf32> to vector<2x8xf32>
    %317 = vector.shape_cast %316 : vector<2x8xf32> to vector<2x8x1xf32>
    %318 = tpu.reciprocal %317 {approx = true} : vector<2x8x1xf32> -> vector<2x8x1xf32>
    %319 = vector.broadcast %318 : vector<2x8x1xf32> to vector<2x8x8xf32>
    %320 = arith.mulf %315, %319 : vector<2x8x8xf32>
    %321 = arith.truncf %320 : vector<2x8x8xf32> to vector<2x8x8xbf16>
    %322 = arith.truncf %305 : vector<2x8x16xf32> to vector<2x8x16xbf16>
    "tpu.trace_start"() <{level = 10 : i32, message = "bqk,bkd->bqd"}> : () -> ()
    %cst_120 = arith.constant dense<0.000000e+00> : vector<2x8x16xf32>
    %323 = tpu.matmul %321, %322, %cst_120 {dimension_numbers = #tpu.dot_dimension_numbers<[2], [1], [1], [2], [0, 0, 0, 1, 1, 2], [0], [0]>} : vector<2x8x8xbf16>, vector<2x8x16xbf16>, vector<2x8x16xf32> -> vector<2x8x16xf32>
    "tpu.trace_stop"() : () -> ()
    %324 = vector.extract_strided_slice %251 {offsets = [0, 48], sizes = [16, 16], strides = [1, 1]} : vector<16x192xf32> to vector<16x16xf32>
    %325 = vector.shape_cast %324 : vector<16x16xf32> to vector<2x8x16xf32>
    %326 = vector.extract_strided_slice %251 {offsets = [0, 112], sizes = [16, 16], strides = [1, 1]} : vector<16x192xf32> to vector<16x16xf32>
    %327 = vector.shape_cast %326 : vector<16x16xf32> to vector<2x8x16xf32>
    %328 = vector.extract_strided_slice %251 {offsets = [0, 176], sizes = [16, 16], strides = [1, 1]} : vector<16x192xf32> to vector<16x16xf32>
    %329 = vector.shape_cast %328 : vector<16x16xf32> to vector<2x8x16xf32>
    %330 = arith.truncf %325 : vector<2x8x16xf32> to vector<2x8x16xbf16>
    %331 = arith.truncf %327 : vector<2x8x16xf32> to vector<2x8x16xbf16>
    "tpu.trace_start"() <{level = 10 : i32, message = "bqd,bkd->bqk"}> : () -> ()
    %cst_121 = arith.constant dense<0.000000e+00> : vector<2x8x8xf32>
    %332 = tpu.matmul %330, %331, %cst_121 {dimension_numbers = #tpu.dot_dimension_numbers<[2], [2], [1], [1], [0, 0, 0, 1, 1, 1], [0], [0]>} : vector<2x8x16xbf16>, vector<2x8x16xbf16>, vector<2x8x8xf32> -> vector<2x8x8xf32>
    "tpu.trace_stop"() : () -> ()
    %333 = vector.broadcast %2 : vector<2x1x8xf32> to vector<2x8x8xf32>
    %334 = arith.addf %332, %333 : vector<2x8x8xf32>
    %cst_122 = arith.constant dense<0xFF800000> : vector<2x8xf32>
    %335 = vector.multi_reduction <maximumf>, %334, %cst_122 [2] : vector<2x8x8xf32> to vector<2x8xf32>
    %336 = vector.shape_cast %335 : vector<2x8xf32> to vector<2x8x1xf32>
    %337 = vector.broadcast %336 : vector<2x8x1xf32> to vector<2x8x8xf32>
    %338 = arith.subf %334, %337 : vector<2x8x8xf32>
    %339 = math.exp %338 : vector<2x8x8xf32>
    %cst_123 = arith.constant dense<0.000000e+00> : vector<2x8xf32>
    %340 = vector.multi_reduction <add>, %339, %cst_123 [2] : vector<2x8x8xf32> to vector<2x8xf32>
    %341 = vector.shape_cast %340 : vector<2x8xf32> to vector<2x8x1xf32>
    %342 = tpu.reciprocal %341 {approx = true} : vector<2x8x1xf32> -> vector<2x8x1xf32>
    %343 = vector.broadcast %342 : vector<2x8x1xf32> to vector<2x8x8xf32>
    %344 = arith.mulf %339, %343 : vector<2x8x8xf32>
    %345 = arith.truncf %344 : vector<2x8x8xf32> to vector<2x8x8xbf16>
    %346 = arith.truncf %329 : vector<2x8x16xf32> to vector<2x8x16xbf16>
    "tpu.trace_start"() <{level = 10 : i32, message = "bqk,bkd->bqd"}> : () -> ()
    %cst_124 = arith.constant dense<0.000000e+00> : vector<2x8x16xf32>
    %347 = tpu.matmul %345, %346, %cst_124 {dimension_numbers = #tpu.dot_dimension_numbers<[2], [1], [1], [2], [0, 0, 0, 1, 1, 2], [0], [0]>} : vector<2x8x8xbf16>, vector<2x8x16xbf16>, vector<2x8x16xf32> -> vector<2x8x16xf32>
    "tpu.trace_stop"() : () -> ()
    %348 = tpu.concatenate %275, %299, %323, %347 in 2 : vector<2x8x16xf32>, vector<2x8x16xf32>, vector<2x8x16xf32>, vector<2x8x16xf32> -> vector<2x8x64xf32>
    %349 = vector.shape_cast %348 : vector<2x8x64xf32> to vector<16x64xf32>
    %350 = arith.truncf %349 : vector<16x64xf32> to vector<16x64xbf16>
    %cst_125 = arith.constant dense<0.000000e+00> : vector<16x128xf32>
    %351 = tpu.matmul %350, %229, %cst_125 {dimension_numbers = #tpu.dot_dimension_numbers<[1], [0], [0], [1], [0, 0, 1, 1], [], []>} : vector<16x64xbf16>, vector<64x128xbf16>, vector<16x128xf32> -> vector<16x128xf32>
    %352 = vector.broadcast %235 : vector<1x128xf32> to vector<16x128xf32>
    %353 = arith.addf %351, %352 : vector<16x128xf32>
    %354 = arith.addf %223, %353 : vector<16x128xf32>
    %cst_126 = arith.constant dense<0.000000e+00> : vector<16xf32>
    %355 = vector.multi_reduction <add>, %354, %cst_126 [1] : vector<16x128xf32> to vector<16xf32>
    %356 = vector.shape_cast %355 : vector<16xf32> to vector<16x1xf32>
    %cst_127 = arith.constant 1.562500e-02 : f32
    %357 = vector.broadcast %cst_127 : f32 to vector<16x1xf32>
    %358 = arith.mulf %356, %357 : vector<16x1xf32>
    %359 = arith.mulf %354, %354 : vector<16x128xf32>
    %cst_128 = arith.constant dense<0.000000e+00> : vector<16xf32>
    %360 = vector.multi_reduction <add>, %359, %cst_128 [1] : vector<16x128xf32> to vector<16xf32>
    %361 = vector.shape_cast %360 : vector<16xf32> to vector<16x1xf32>
    %cst_129 = arith.constant 1.562500e-02 : f32
    %362 = vector.broadcast %cst_129 : f32 to vector<16x1xf32>
    %363 = arith.mulf %361, %362 : vector<16x1xf32>
    %364 = arith.mulf %358, %358 : vector<16x1xf32>
    %365 = arith.subf %363, %364 : vector<16x1xf32>
    %366 = vector.broadcast %358 : vector<16x1xf32> to vector<16x128xf32>
    %367 = arith.subf %354, %366 : vector<16x128xf32>
    %cst_130 = arith.constant 9.99999996E-13 : f32
    %368 = vector.broadcast %cst_130 : f32 to vector<16x1xf32>
    %369 = arith.addf %365, %368 : vector<16x1xf32>
    %370 = math.rsqrt %369 : vector<16x1xf32>
    %371 = vector.broadcast %370 : vector<16x1xf32> to vector<16x128xf32>
    %372 = arith.mulf %367, %371 : vector<16x128xf32>
    %373 = vector.broadcast %237 : vector<1x128xf32> to vector<16x128xf32>
    %374 = arith.mulf %372, %373 : vector<16x128xf32>
    %375 = vector.broadcast %239 : vector<1x128xf32> to vector<16x128xf32>
    %376 = arith.addf %374, %375 : vector<16x128xf32>
    %377 = arith.truncf %376 : vector<16x128xf32> to vector<16x128xbf16>
    %cst_131 = arith.constant dense<0.000000e+00> : vector<16x128xf32>
    %378 = tpu.matmul %377, %225, %cst_131 {dimension_numbers = #tpu.dot_dimension_numbers<[1], [0], [0], [1], [0, 0, 1, 1], [], []>} : vector<16x128xbf16>, vector<128x128xbf16>, vector<16x128xf32> -> vector<16x128xf32>
    %379 = vector.broadcast %241 : vector<1x128xf32> to vector<16x128xf32>
    %380 = arith.addf %378, %379 : vector<16x128xf32>
    %381 = arith.mulf %380, %380 : vector<16x128xf32>
    %382 = arith.mulf %380, %381 : vector<16x128xf32>
    %cst_132 = arith.constant 4.471500e-02 : f32
    %383 = vector.broadcast %cst_132 : f32 to vector<16x128xf32>
    %384 = arith.mulf %383, %382 : vector<16x128xf32>
    %385 = arith.addf %380, %384 : vector<16x128xf32>
    %cst_133 = arith.constant 0.797884583 : f32
    %386 = vector.broadcast %cst_133 : f32 to vector<16x128xf32>
    %387 = arith.mulf %386, %385 : vector<16x128xf32>
    %388 = math.tanh %387 : vector<16x128xf32>
    %cst_134 = arith.constant 1.000000e+00 : f32
    %389 = vector.broadcast %cst_134 : f32 to vector<16x128xf32>
    %390 = arith.addf %389, %388 : vector<16x128xf32>
    %cst_135 = arith.constant 5.000000e-01 : f32
    %391 = vector.broadcast %cst_135 : f32 to vector<16x128xf32>
    %392 = arith.mulf %391, %390 : vector<16x128xf32>
    %393 = arith.mulf %380, %392 : vector<16x128xf32>
    %394 = arith.truncf %393 : vector<16x128xf32> to vector<16x128xbf16>
    %cst_136 = arith.constant dense<0.000000e+00> : vector<16x128xf32>
    %395 = tpu.matmul %394, %227, %cst_136 {dimension_numbers = #tpu.dot_dimension_numbers<[1], [0], [0], [1], [0, 0, 1, 1], [], []>} : vector<16x128xbf16>, vector<128x128xbf16>, vector<16x128xf32> -> vector<16x128xf32>
    %396 = vector.broadcast %243 : vector<1x128xf32> to vector<16x128xf32>
    %397 = arith.addf %395, %396 : vector<16x128xf32>
    %398 = arith.addf %376, %397 : vector<16x128xf32>
    %cst_137 = arith.constant dense<0.000000e+00> : vector<16xf32>
    %399 = vector.multi_reduction <add>, %398, %cst_137 [1] : vector<16x128xf32> to vector<16xf32>
    %400 = vector.shape_cast %399 : vector<16xf32> to vector<16x1xf32>
    %cst_138 = arith.constant 1.562500e-02 : f32
    %401 = vector.broadcast %cst_138 : f32 to vector<16x1xf32>
    %402 = arith.mulf %400, %401 : vector<16x1xf32>
    %403 = arith.mulf %398, %398 : vector<16x128xf32>
    %cst_139 = arith.constant dense<0.000000e+00> : vector<16xf32>
    %404 = vector.multi_reduction <add>, %403, %cst_139 [1] : vector<16x128xf32> to vector<16xf32>
    %405 = vector.shape_cast %404 : vector<16xf32> to vector<16x1xf32>
    %cst_140 = arith.constant 1.562500e-02 : f32
    %406 = vector.broadcast %cst_140 : f32 to vector<16x1xf32>
    %407 = arith.mulf %405, %406 : vector<16x1xf32>
    %408 = arith.mulf %402, %402 : vector<16x1xf32>
    %409 = arith.subf %407, %408 : vector<16x1xf32>
    %410 = vector.broadcast %402 : vector<16x1xf32> to vector<16x128xf32>
    %411 = arith.subf %398, %410 : vector<16x128xf32>
    %cst_141 = arith.constant 9.99999996E-13 : f32
    %412 = vector.broadcast %cst_141 : f32 to vector<16x1xf32>
    %413 = arith.addf %409, %412 : vector<16x1xf32>
    %414 = math.rsqrt %413 : vector<16x1xf32>
    %415 = vector.broadcast %414 : vector<16x1xf32> to vector<16x128xf32>
    %416 = arith.mulf %411, %415 : vector<16x128xf32>
    %417 = vector.broadcast %245 : vector<1x128xf32> to vector<16x128xf32>
    %418 = arith.mulf %416, %417 : vector<16x128xf32>
    %419 = vector.broadcast %247 : vector<1x128xf32> to vector<16x128xf32>
    %420 = arith.addf %418, %419 : vector<16x128xf32>
    %421 = vector.shape_cast %420 : vector<16x128xf32> to vector<2x8x128xf32>
    %c0_142 = arith.constant 0 : index
    %c0_143 = arith.constant 0 : index
    %c0_144 = arith.constant 0 : index
    %422 = vector.load %arg4[%c0_142, %c0_143, %c0_144] : memref<2x8x128xf32, #tpu.memory_space<vmem>>, vector<2x8x128xf32>
    tpu.vector_store %arg4[%c0_142, %c0_143, %c0_144], %421 {strides = array<i32>} : memref<2x8x128xf32, #tpu.memory_space<vmem>>, vector<2x8x128xf32>,
    return
  }
}

</mosaic_0001>

<bundles_post_ra>
// kernel: bert_forward.1
= control target key start
LH: loop header
LB: loop body
LE: loop exit
PB: predicated region body
PF: predicated region fallthrough
CT: control target
= control target key end

     0   :  { %v3766_v17 = vmov 0   ;;  %v128_v48 = vlaneseq  ;;  %v3767_v50 = vmov 0.0   ;;  %vm3768_vm0 = vmmov 0   ;;  %s3769_s30 = smov 64   ;;  %s3770_s9 = smov 48   ;;  %s4569_s0 = inlined_call_operand.vmem [shape: f32[2,16,128], index: 0, kind: input, shape index: {}]   ;;  %s4570_s2 = inlined_call_operand.vmem [shape: bf16[2,128,576], index: 2, kind: input, shape index: {}]   ;;  %s4571_s1 = inlined_call_operand.vmem [shape: f32[2,128], index: 1, kind: input, shape index: {}]   ;;  %s4572_s3 = inlined_call_operand.vmem [shape: f32[2,8,256], index: 3, kind: input, shape index: {}]   ;;  %s4573_s4 = inlined_call_operand.vmem [shape: f32[2,8,128], index: 4, kind: output, shape index: {}]  }
   0x1   :  { %v18_v0 = vld [vmem:[%s4569_s0] sm:$0xff]  ;;  %v3807_v2 = vld [vmem:[%s4569_s0 + $0x10] sm:$0xff]  ;;  %v3587_v6 = vld [vmem:[%s4570_s2 + $0x38] ss:$20 sps:$4 sm:$0xff]   ;;  %250 = vmatprep.mubr.bf16.mxu0 %v3766_v17  ;;  %3248 = vmatprep.subr.bf16.mxu1 %v3767_v50  ;;  %vm274_vm1 = vcmask 130048   ;;  %vm400_vm2 = vcmask 1043456  }
   0x2   :  { %24 = vadd.xlane.f32.xlu0 %v18_v0  ;;  %v30_v1 = vmul.f32 %v18_v0, %v18_v0  ;;  %v3584_v3 = vld [vmem:[%s4570_s2 + $0x10] ss:$20 sps:$4 sm:$0xff]   ;;  %v31_v4 = vmul.f32 %v3807_v2, %v3807_v2  ;;  %v3586_v5 = vld [vmem:[%s4570_s2 + $0xc] ss:$20 sps:$4 sm:$0xff]   ;;  %v3589_v7 = vld [vmem:[%s4570_s2 + $0x34] ss:$20 sps:$4 sm:$0xff]   ;;  %3250 = vmatprep.mubr.msk.bf16.mxu1 %vm3768_vm0, %v3767_v50 }
   0x3   :  { %218 = vmatprep.subr.bf16.mxu0 %v3584_v3  ;;  %v3590_v8 = vld [vmem:[%s4570_s2 + $0x60] ss:$20 sps:$4 sm:$0xff]   ;;  %v3592_v9 = vld [vmem:[%s4570_s2 + $0x5c] ss:$20 sps:$4 sm:$0xff]   ;;  %v3595_v11 = vld [vmem:[%s4570_s2 + $0x84] ss:$20 sps:$4 sm:$0xff]  }
   0x4   :  { %32 = vadd.xlane.f32.xlu1 %v30_v1  ;;  %219 = vmatpush1.bf16.msra.mxu0 %v3586_v5  ;;  %v3593_v10 = vld [vmem:[%s4570_s2 + $0x88] ss:$20 sps:$4 sm:$0xff]   ;;  %v3596_v12 = vld [vmem:[%s4570_s2 + $0xb0] ss:$20 sps:$4 sm:$0xff]   ;;  %v3598_v13 = vld [vmem:[%s4570_s2 + $0xac] ss:$20 sps:$4 sm:$0xff]  }
   0x5   :  { %220 = vmatprep.subr.bf16.mxu0 %v3587_v6  ;;  %v3599_v14 = vld [vmem:[%s4570_s2 + $0xd8] ss:$20 sps:$4 sm:$0xff]   ;;  %v3601_v15 = vld [vmem:[%s4570_s2 + $0xd4] ss:$20 sps:$4 sm:$0xff]   ;;  %v3604_v18 = vld [vmem:[%s4570_s2 + $0xfc] ss:$20 sps:$4 sm:$0xff]  }
   0x6   :  { %26 = vadd.xlane.f32.xlu0 %v3807_v2  ;;  %v3602_v16 = vld [vmem:[%s4570_s2 + $0x100] ss:$20 sps:$4 sm:$0xff]   ;;  %v3605_v19 = vld [vmem:[%s4570_s2 + $0x128] ss:$20 sps:$4 sm:$0xff]   ;;  %v3607_v20 = vld [vmem:[%s4570_s2 + $0x124] ss:$20 sps:$4 sm:$0xff]  }
   0x7   :  { %v2964_v38 = vld [vmem:[%s4571_s1] ss:$0 sm:$0xff]  ;;  %v2965_v43 = vld [vmem:[%s4571_s1 + $0x1] ss:$0 sm:$0xff]  ;;  %v3874_v49 = vshrl.u32 %v128_v48, 7  ;;  %vm370_vm3 = vcmask 64512  }
   0x8   :  { %34 = vadd.xlane.f32.xlu1 %v31_v4  ;;  %221 = vmatpush1.bf16.msra.mxu0 %v3589_v7  ;;  %v118_v52 = vld [vmem:[%s4572_s3] ss:$8 sm:$0x3]  ;;  %s3771_s10 = smov 112   ;;  %s3772_s11 = smov 32   ;;  %vm1178_vm4 = vcmask 261120  }
   0x9   :  { %222 = vmatprep.subr.bf16.mxu0 %v3590_v8  ;;  %v130_v51 = vsub.s32 0, %v3874_v49  ;;  %v134_v54 = vsub.s32 1, %v3874_v49  ;;  %v3921_v8 = vld [vmem:[%s4569_s0 + $0x8] ss:$0 sm:$0xff]  ;;  %s3773_s12 = smov 96   ;;  %s3774_s13 = smov 16  }
   0xa   :  { %s3775_s14 = smov 80   ;;  %vm1181_vm5 = vcmask 392192   ;;  %vm1209_vm6 = vcmask 523264  }
   0xb   :  { %v131_v53 = vrot.slane %v118_v52, %v130_v51  ;;  %v135_v58 = vrot.slane %v118_v52, %v134_v54 }
   0xc   :  { %223 = vmatpush1.bf16.msra.mxu0 %v3592_v9 }
   0xd   :  { %224 = vmatprep.subr.bf16.mxu0 %v3593_v10 }
  0x10   :  { %225 = vmatpush1.bf16.msra.mxu0 %v3595_v11 }
  0x11   :  { %226 = vmatprep.subr.bf16.mxu0 %v3596_v12 }
  0x14   :  { %227 = vmatpush1.bf16.msra.mxu0 %v3598_v13 }
  0x15   :  { %228 = vmatprep.subr.bf16.mxu0 %v3599_v14 }
  0x18   :  { %229 = vmatpush1.bf16.msra.mxu0 %v3601_v15  ;;  %v3928_v15 = vld [vmem:[%s4569_s0 + $0x18] ss:$0 sm:$0xff] }
  0x19   :  { %230 = vmatprep.subr.bf16.mxu0 %v3602_v16 }
  0x1c   :  { %231 = vmatpush1.bf16.msra.mxu0 %v3604_v18 }
  0x1d   :  { %232 = vmatprep.subr.bf16.mxu0 %v3605_v19 }
  0x20   :  { %233 = vmatpush1.bf16.msra.mxu0 %v3607_v20 }
  0x21   :  { %3284 = vmatprep.subr.bf16.mxu0 %v3767_v50 }
  0x8f   :  { %v25_v21 = vpop.xlane.xlu0 %24 }
  0x90   :  { %v28_v22 = vmul.f32 0.015625, %v25_v21 }
  0x91   :  { %v33_v23 = vpop.xlane.xlu1 %32 }
  0x92   :  { %v38_v24 = vmul.f32 %v28_v22, %v28_v22  ;;  %v36_v25 = vmul.f32 0.015625, %v33_v23  ;;  %v42_v35 = vsub.f32 %v18_v0, %v28_v22 }
  0x93   :  { %v27_v26 = vpop.xlane.xlu0 %26 }
  0x94   :  { %v40_v27 = vsub.f32 %v36_v25, %v38_v24  ;;  %v29_v28 = vmul.f32 0.015625, %v27_v26 }
  0x95   :  { %v35_v29 = vpop.xlane.xlu1 %34 }
  0x96   :  { %v44_v30 = vadd.f32 1e-12, %v40_v27  ;;  %v39_v31 = vmul.f32 %v29_v28, %v29_v28  ;;  %v37_v32 = vmul.f32 0.015625, %v35_v29  ;;  %v43_v39 = vsub.f32 %v3807_v2, %v29_v28 }
  0x98   :  { %3672 = vrsqrt.f32 %v44_v30  ;;  %v41_v33 = vsub.f32 %v37_v32, %v39_v31 }
  0x9a   :  { %v45_v34 = vadd.f32 1e-12, %v41_v33 }
  0x9c   :  { %3674 = vrsqrt.f32 %v45_v34 }
  0xa2   :  { %v3673_v36 = vpop.eup %3672 }
  0xa3   :  { %v48_v37 = vmul.f32 %v3673_v36, %v42_v35 }
  0xa5   :  { %v54_v42 = vmul.f32 %v2964_v38, %v48_v37 }
  0xa6   :  { %v3675_v40 = vpop.eup %3674 }
  0xa7   :  { %v49_v41 = vmul.f32 %v3675_v40, %v43_v39  ;;  %v3868_v45 = vadd.f32 %v2965_v43, %v54_v42 }
  0xa9   :  { %v55_v44 = vmul.f32 %v2964_v38, %v49_v41 }
  0xab   :  { %v3870_v46 = vadd.f32 %v2965_v43, %v55_v44 }
  0xad   :  { %v126_v47 = vpack.c.bf16 %v3870_v46, %v3868_v45 }
  0xaf   :  { %251 = vmatmul.mubr.bf16.vlgmr.msra.gmra.mrb[0].mxu0 %v126_v47 }
  0xb0   :  { %3286 = vmatprep.mubr.msk.bf16.mxu0 %vm3768_vm0, %v3767_v50 }
 0x182   :  { %v252_v55 = vpop.f32.mrb[0].mxu0 }
 0x183   :  { %v253_v56 = vadd.f32 %v252_v55, %v131_v53  ;;  %v254_v57 = vpop.f32.mrb[1].mxu0 }
 0x184   :  { %v256_v59 = vpop.f32.mrb[2].mxu0  ;;  %v255_v4 = vadd.f32 %v254_v57, %v135_v58 }
 0x185   :  { %v3891_v60 = vpack.c.bf16 %v253_v56, %v253_v56  ;;  %v257_v61 = vadd.f32 %v256_v59, %v131_v53  ;;  %v258_v62 = vpop.f32.mrb[3].mxu0 }
 0x186   :  { %v3893_v63 = vadd.f32 %v258_v62, %v135_v58  ;;  %v3909_v6 = vpack.c.bf16 %v255_v4, %v255_v4 }
 0x187   :  { %v3895_v0 = vpack.c.bf16 %v257_v61, %v257_v61  ;;  %272 = vrot.lane.b32.xlu0 %v3891_v60, %s3769_s30 }
 0x188   :  { %v402_v7 = vsel %vm400_vm2, %v3909_v6, 0  ;;  %v3944_v36 = vpack.c.bf16 %v3893_v63, %v3893_v63 }
 0x189   :  { %322 = vrot.lane.b32.xlu1 %v3895_v0, %s3769_s30 }
 0x18a   :  { %v448_v39 = vsel %vm400_vm2, %v3944_v36, 0 }
 0x1f9   :  { %v273_v1 = vpop.permute.xlu0 %272 }
 0x1fa   :  { %v279_v2 = vsel %vm274_vm1, %v273_v1, 0 }
 0x1fb   :  { %3249 = vmatpush3.bf16.xpose.msra.mxu1 %v279_v2  ;;  %v323_v3 = vpop.permute.xlu1 %322 }
 0x1fc   :  { %3254 = vmatprep.subr.bf16.mxu1 %v3767_v50  ;;  %v328_v5 = vsel %vm274_vm1, %v323_v3, 0 }
 0x202   :  { %3251 = vmatmul.mubr.msk.bf16.vlgmr.msra.gmra.mrb[0].mxu1 %vm274_vm1, %v3891_v60 }
 0x203   :  { %3255 = vmatpush3.bf16.xpose.msra.mxu1 %v328_v5  ;;  %3256 = vmatprep.mubr.msk.bf16.mxu1 %vm3768_vm0, %v3767_v50 }
 0x204   :  { %3260 = vmatprep.subr.bf16.mxu1 %v3767_v50 }
 0x20a   :  { %3257 = vmatmul.mubr.msk.bf16.vlgmr.msra.gmra.mrb[4].mxu1 %vm274_vm1, %v3895_v0 }
 0x20b   :  { %3261 = vmatpush3.bf16.msra.mxu1 %v402_v7  ;;  %3262 = vmatprep.mubr.msk.bf16.mxu1 %vm3768_vm0, %v3767_v50 }
 0x20c   :  { %3266 = vmatprep.subr.bf16.mxu1 %v3767_v50 }
 0x2d5   :  { %v315_v9 = vpop.f32.mrb[0].mxu1 }
 0x2d6   :  { %v316_v10 = vadd.f32 %v3921_v8, %v315_v9  ;;  %v3252_v11 = vpop.f32.mrb[1].mxu1 }
 0x2d7   :  { %v318_v12 = vpop.f32.mrb[2].mxu1 }
 0x2d8   :  { %v3253_v13 = vpop.f32.mrb[3].mxu1  ;;  %v371_v14 = vsel %vm370_vm3, %v316_v10, -inf }
 0x2d9   :  { %372 = vmax.xlane.f32.xlu1 %v371_v14 }
 0x2dd   :  { %v364_v16 = vpop.f32.mrb[4].mxu1 }
 0x2de   :  { %v365_v18 = vadd.f32 %v3928_v15, %v364_v16  ;;  %v3258_v19 = vpop.f32.mrb[5].mxu1 }
 0x2df   :  { %v367_v20 = vpop.f32.mrb[6].mxu1 }
 0x2e0   :  { %v3259_v21 = vpop.f32.mrb[7].mxu1  ;;  %v374_v22 = vsel %vm370_vm3, %v365_v18, -inf }
 0x2e1   :  { %375 = vmax.xlane.f32.xlu0 %v374_v22 }
 0x366   :  { %v373_v23 = vpop.xlane.xlu1 %372 }
 0x367   :  { %v377_v24 = vsub.f32 %v316_v10, %v373_v23 }
 0x369   :  { %v379_v25 = vmul.f32 1.442695, %v377_v24 }
 0x36b   :  { %3676 = vpow2.f32 %v379_v25 }
 0x36e   :  { %v376_v26 = vpop.xlane.xlu0 %375 }
 0x36f   :  { %v378_v27 = vsub.f32 %v365_v18, %v376_v26 }
 0x371   :  { %v381_v28 = vmul.f32 1.442695, %v378_v27 }
 0x373   :  { %3678 = vpow2.f32 %v381_v28 }
 0x375   :  { %v3677_v29 = vpop.eup %3676 }
 0x376   :  { %v383_v30 = vsel %vm370_vm3, %v3677_v29, 0.0 }
 0x377   :  { %384 = vadd.xlane.f32.xlu0 %v383_v30 }
 0x37d   :  { %v3679_v31 = vpop.eup %3678 }
 0x37e   :  { %v386_v32 = vsel %vm370_vm3, %v3679_v31, 0.0 }
 0x37f   :  { %387 = vadd.xlane.f32.xlu1 %v386_v32 }
 0x38d   :  { %492 = vrot.lane.b32.xlu0 %v3891_v60, %s3770_s9 }
 0x390   :  { %490 = vrot.lane.b32.xlu1 %v3891_v60, %s3771_s10 }
 0x394   :  { %542 = vrot.lane.b32.xlu1 %v3895_v0, %s3770_s9 }
 0x398   :  { %540 = vrot.lane.b32.xlu1 %v3895_v0, %s3771_s10 }
 0x404   :  { %v385_v33 = vpop.xlane.xlu0 %384 }
 0x405   :  { %3680 = vrcp.f32 %v385_v33 }
 0x408   :  { %v493_v42 = vpop.permute.xlu0 %492 }
 0x409   :  { %v498_v47 = vsel %vm274_vm1, %v493_v42, 0 }
 0x40c   :  { %v388_v34 = vpop.xlane.xlu1 %387 }
 0x40d   :  { %3682 = vrcp.f32 %v388_v34 }
 0x40f   :  { %v3681_v35 = vpop.eup %3680 }
 0x410   :  { %v391_v37 = vmul.f32 %v3681_v35, %v3677_v29  ;;  %v491_v44 = vpop.permute.xlu1 %490 }
 0x412   :  { %v393_v38 = vpack.c.bf16 %v391_v37, %v391_v37 }
 0x414   :  { %3263 = vmatmul.mubr.msk.bf16.vlgmr.msra.gmra.mrb[8].mxu1 %vm370_vm3, %v393_v38  ;;  %v543_v48 = vpop.permute.xlu1 %542 }
 0x415   :  { %3267 = vmatpush3.bf16.msra.mxu1 %v448_v39  ;;  %3268 = vmatprep.mubr.msk.bf16.mxu1 %vm3768_vm0, %v3767_v50  ;;  %v548_v52 = vsel %vm274_vm1, %v543_v48, 0 }
 0x416   :  { %3272 = vmatprep.subr.bf16.mxu1 %v3767_v50 }
 0x417   :  { %v3683_v40 = vpop.eup %3682 }
 0x418   :  { %v392_v41 = vmul.f32 %v3683_v40, %v3679_v31  ;;  %v541_v53 = vpop.permute.xlu1 %540 }
 0x41a   :  { %v394_v43 = vpack.c.bf16 %v392_v41, %v392_v41 }
 0x41c   :  { %3269 = vmatmul.mubr.msk.bf16.vlgmr.msra.gmra.mrb[12].mxu1 %vm370_vm3, %v394_v43 }
 0x41d   :  { %3274 = vmatprep.mubr.msk.bf16.mxu1 %vm3768_vm0, %v3767_v50 }
 0x41e   :  { %3273 = vmatpush3.bf16.xpose.msra.mxu1 %v498_v47 }
 0x41f   :  { %3278 = vmatprep.subr.bf16.mxu1 %v3767_v50 }
 0x425   :  { %3275 = vmatmul.mubr.msk.bf16.vlgmr.msra.gmra.mrb[16].mxu1 %vm274_vm1, %v491_v44 }
 0x426   :  { %3279 = vmatpush3.bf16.xpose.msra.mxu1 %v548_v52  ;;  %3280 = vmatprep.mubr.msk.bf16.mxu1 %vm3768_vm0, %v3767_v50 }
 0x427   :  { %3290 = vmatprep.subr.bf16.mxu1 %v3767_v50 }
 0x42d   :  { %3281 = vmatmul.mubr.msk.bf16.vlgmr.msra.gmra.mrb[20].mxu1 %vm274_vm1, %v541_v53 }
 0x42e   :  { %3292 = vmatprep.mubr.msk.bf16.mxu1 %vm3768_vm0, %v3767_v50 }
 0x4e7   :  { %v3965_v55 = vpop.f32.mrb[8].mxu1 }
 0x4e8   :  { %v3264_v56 = vpop.f32.mrb[9].mxu1 }
 0x4e9   :  { %v441_v57 = vpop.f32.mrb[10].mxu1 }
 0x4ea   :  { %v3265_v58 = vpop.f32.mrb[11].mxu1 }
 0x4ef   :  { %v3967_v59 = vpop.f32.mrb[12].mxu1 }
 0x4f0   :  { %v3270_v61 = vpop.f32.mrb[13].mxu1 }
 0x4f1   :  { %v487_v62 = vpop.f32.mrb[14].mxu1 }
 0x4f2   :  { %v3271_v63 = vpop.f32.mrb[15].mxu1 }
 0x4f8   :  { %v534_v1 = vpop.f32.mrb[16].mxu1 }
 0x4f9   :  { %v535_v2 = vadd.f32 %v3921_v8, %v534_v1  ;;  %v3276_v3 = vpop.f32.mrb[17].mxu1 }
 0x4fa   :  { %v537_v4 = vpop.f32.mrb[18].mxu1 }
 0x4fb   :  { %v3277_v5 = vpop.f32.mrb[19].mxu1  ;;  %v590_v7 = vsel %vm370_vm3, %v535_v2, -inf }
 0x4fc   :  { %591 = vmax.xlane.f32.xlu0 %v590_v7 }
 0x500   :  { %v584_v9 = vpop.f32.mrb[20].mxu1 }
 0x501   :  { %v585_v10 = vadd.f32 %v3928_v15, %v584_v9  ;;  %v3282_v11 = vpop.f32.mrb[21].mxu1 }
 0x502   :  { %v587_v12 = vpop.f32.mrb[22].mxu1 }
 0x503   :  { %v3283_v13 = vpop.f32.mrb[23].mxu1  ;;  %v593_v14 = vsel %vm370_vm3, %v585_v10, -inf }
 0x504   :  { %594 = vmax.xlane.f32.xlu1 %v593_v14 }
 0x515   :  { %664 = vrot.lane.b32.xlu1 %v3944_v36, %s3771_s10 }
 0x519   :  { %714 = vrot.lane.b32.xlu1 %v3891_v60, %s3772_s11 }
 0x51d   :  { %764 = vrot.lane.b32.xlu1 %v3895_v0, %s3772_s11 }
 0x521   :  { %762 = vrot.lane.b32.xlu1 %v3895_v0, %s3773_s12 }
 0x589   :  { %v592_v16 = vpop.xlane.xlu0 %591 }
 0x58a   :  { %v596_v18 = vsub.f32 %v535_v2, %v592_v16 }
 0x58c   :  { %v598_v19 = vmul.f32 1.442695, %v596_v18 }
 0x58e   :  { %3684 = vpow2.f32 %v598_v19 }
 0x591   :  { %v595_v20 = vpop.xlane.xlu1 %594 }
 0x592   :  { %v597_v21 = vsub.f32 %v585_v10, %v595_v20 }
 0x594   :  { %v600_v22 = vmul.f32 1.442695, %v597_v21 }
 0x595   :  { %v665_v23 = vpop.permute.xlu1 %664 }
 0x596   :  { %3686 = vpow2.f32 %v600_v22  ;;  %v670_v24 = vsel %vm400_vm2, %v665_v23, 0 }
 0x597   :  { %3291 = vmatpush3.bf16.msra.mxu1 %v670_v24 }
 0x598   :  { %v3685_v25 = vpop.eup %3684  ;;  %3302 = vmatprep.subr.bf16.mxu1 %v3767_v50 }
 0x599   :  { %v602_v26 = vsel %vm370_vm3, %v3685_v25, 0.0  ;;  %v715_v37 = vpop.permute.xlu1 %714 }
 0x59a   :  { %603 = vadd.xlane.f32.xlu0 %v602_v26  ;;  %v720_v41 = vsel %vm274_vm1, %v715_v37, 0 }
 0x59d   :  { %v765_v40 = vpop.permute.xlu1 %764 }
 0x59e   :  { %v770_v43 = vsel %vm274_vm1, %v765_v40, 0 }
 0x5a0   :  { %v3687_v27 = vpop.eup %3686 }
 0x5a1   :  { %v605_v28 = vsel %vm370_vm3, %v3687_v27, 0.0  ;;  %v763_v47 = vpop.permute.xlu1 %762 }
 0x5a2   :  { %606 = vadd.xlane.f32.xlu0 %v605_v28 }
 0x5b8   :  { %615 = vrot.lane.b32.xlu0 %v3909_v6, %s3771_s10 }
 0x5bc   :  { %712 = vrot.lane.b32.xlu0 %v3891_v60, %s3773_s12 }
 0x627   :  { %v604_v29 = vpop.xlane.xlu0 %603 }
 0x628   :  { %3688 = vrcp.f32 %v604_v29 }
 0x62f   :  { %v607_v30 = vpop.xlane.xlu0 %606 }
 0x630   :  { %3690 = vrcp.f32 %v607_v30 }
 0x632   :  { %v3689_v31 = vpop.eup %3688 }
 0x633   :  { %v610_v32 = vmul.f32 %v3689_v31, %v3685_v25  ;;  %v616_v33 = vpop.permute.xlu0 %615 }
 0x634   :  { %v621_v34 = vsel %vm400_vm2, %v616_v33, 0 }
 0x635   :  { %3285 = vmatpush3.bf16.msra.mxu0 %v621_v34  ;;  %v612_v35 = vpack.c.bf16 %v610_v32, %v610_v32 }
 0x636   :  { %3296 = vmatprep.subr.bf16.mxu0 %v3767_v50 }
 0x637   :  { %v713_v44 = vpop.permute.xlu0 %712 }
 0x638   :  { %3287 = vmatmul.mubr.msk.bf16.vlgmr.msra.gmra.mrb[4].mxu0 %vm370_vm3, %v612_v35 }
 0x639   :  { %3298 = vmatprep.mubr.msk.bf16.mxu0 %vm3768_vm0, %v3767_v50 }
 0x63a   :  { %v3691_v38 = vpop.eup %3690 }
 0x63b   :  { %v611_v39 = vmul.f32 %v3691_v38, %v3687_v27 }
 0x63d   :  { %v613_v42 = vpack.c.bf16 %v611_v39, %v611_v39 }
 0x63e   :  { %3297 = vmatpush3.bf16.xpose.msra.mxu0 %v720_v41 }
 0x63f   :  { %3293 = vmatmul.mubr.msk.bf16.vlgmr.msra.gmra.mrb[24].mxu1 %vm370_vm3, %v613_v42  ;;  %3308 = vmatprep.subr.bf16.mxu0 %v3767_v50 }
 0x640   :  { %3303 = vmatpush3.bf16.xpose.msra.mxu1 %v770_v43  ;;  %3304 = vmatprep.mubr.msk.bf16.mxu1 %vm3768_vm0, %v3767_v50 }
 0x641   :  { %3314 = vmatprep.subr.bf16.mxu1 %v3767_v50 }
 0x645   :  { %3299 = vmatmul.mubr.msk.bf16.vlgmr.msra.gmra.mrb[8].mxu0 %vm274_vm1, %v713_v44 }
 0x646   :  { %3310 = vmatprep.mubr.msk.bf16.mxu0 %vm3768_vm0, %v3767_v50 }
 0x647   :  { %3305 = vmatmul.mubr.msk.bf16.vlgmr.msra.gmra.mrb[28].mxu1 %vm274_vm1, %v763_v47 }
 0x648   :  { %3316 = vmatprep.mubr.msk.bf16.mxu1 %vm3768_vm0, %v3767_v50 }
 0x70b   :  { %v4007_v48 = vpop.f32.mrb[4].mxu0 }
 0x70c   :  { %v3288_v52 = vpop.f32.mrb[5].mxu0 }
 0x70d   :  { %v660_v53 = vpop.f32.mrb[6].mxu0 }
 0x70e   :  { %v3289_v56 = vpop.f32.mrb[7].mxu0 }
 0x712   :  { %v4009_v57 = vpop.f32.mrb[24].mxu1 }
 0x713   :  { %v3554_v58 = vpack.i.bf16 %v4009_v57, %v4007_v48  ;;  %v3294_v61 = vpop.f32.mrb[25].mxu1 }
 0x714   :  { %v709_v62 = vpop.f32.mrb[26].mxu1 }
 0x715   :  { %v3295_v63 = vpop.f32.mrb[27].mxu1 }
 0x718   :  { %v756_v1 = vpop.f32.mrb[8].mxu0 }
 0x719   :  { %v757_v2 = vadd.f32 %v3921_v8, %v756_v1  ;;  %v3300_v3 = vpop.f32.mrb[9].mxu0 }
 0x71a   :  { %v759_v4 = vpop.f32.mrb[10].mxu0  ;;  %v806_v5 = vpop.f32.mrb[28].mxu1 }
 0x71b   :  { %v807_v7 = vadd.f32 %v3928_v15, %v806_v5  ;;  %v3301_v9 = vpop.f32.mrb[11].mxu0  ;;  %v3306_v10 = vpop.f32.mrb[29].mxu1  ;;  %v812_v11 = vsel %vm370_vm3, %v757_v2, -inf }
 0x71c   :  { %813 = vmax.xlane.f32.xlu0 %v812_v11  ;;  %v809_v12 = vpop.f32.mrb[30].mxu1 }
 0x71d   :  { %v3307_v13 = vpop.f32.mrb[31].mxu1  ;;  %v815_v14 = vsel %vm370_vm3, %v807_v7, -inf }
 0x71e   :  { %816 = vmax.xlane.f32.xlu1 %v815_v14 }
 0x72f   :  { %884 = vrot.lane.b32.xlu1 %v3944_v36, %s3773_s12 }
 0x733   :  { %934 = vrot.lane.b32.xlu1 %v3891_v60, %s3774_s13 }
 0x737   :  { %984 = vrot.lane.b32.xlu1 %v3895_v0, %s3774_s13 }
 0x73b   :  { %982 = vrot.lane.b32.xlu1 %v3895_v0, %s3775_s14 }
 0x7a9   :  { %v814_v16 = vpop.xlane.xlu0 %813 }
 0x7aa   :  { %v818_v18 = vsub.f32 %v757_v2, %v814_v16 }
 0x7ab   :  { %v817_v19 = vpop.xlane.xlu1 %816 }
 0x7ac   :  { %v820_v20 = vmul.f32 1.442695, %v818_v18  ;;  %v819_v21 = vsub.f32 %v807_v7, %v817_v19 }
 0x7ae   :  { %3692 = vpow2.f32 %v820_v20  ;;  %v822_v22 = vmul.f32 1.442695, %v819_v21 }
 0x7af   :  { %v885_v23 = vpop.permute.xlu1 %884 }
 0x7b0   :  { %3694 = vpow2.f32 %v822_v22  ;;  %v890_v24 = vsel %vm400_vm2, %v885_v23, 0 }
 0x7b1   :  { %3315 = vmatpush3.bf16.msra.mxu1 %v890_v24 }
 0x7b2   :  { %3326 = vmatprep.subr.bf16.mxu1 %v3767_v50 }
 0x7b3   :  { %v935_v33 = vpop.permute.xlu1 %934 }
 0x7b7   :  { %v985_v39 = vpop.permute.xlu1 %984 }
 0x7b8   :  { %v3693_v25 = vpop.eup %3692  ;;  %v990_v41 = vsel %vm274_vm1, %v985_v39, 0 }
 0x7b9   :  { %v824_v26 = vsel %vm370_vm3, %v3693_v25, 0.0 }
 0x7ba   :  { %v3695_v27 = vpop.eup %3694  ;;  %825 = vadd.xlane.f32.xlu0 %v824_v26 }
 0x7bb   :  { %v827_v0 = vsel %vm370_vm3, %v3695_v27, 0.0  ;;  %v983_v43 = vpop.permute.xlu1 %982 }
 0x7be   :  { %828 = vadd.xlane.f32.xlu0 %v827_v0 }
 0x7d4   :  { %836 = vrot.lane.b32.xlu0 %v3909_v6, %s3773_s12 }
 0x7d8   :  { %932 = vrot.lane.b32.xlu0 %v3891_v60, %s3775_s14  ;;  %v940_v60 = vsel %vm274_vm1, %v935_v33, 0  ;;  %v3609_v33 = vld [vmem:[%s4570_s2 + $0x30] ss:$20 sps:$4 sm:$0xff]  }
 0x847   :  { %v826_v28 = vpop.xlane.xlu0 %825 }
 0x848   :  { %3696 = vrcp.f32 %v826_v28 }
 0x84b   :  { %v829_v29 = vpop.xlane.xlu0 %828 }
 0x84c   :  { %3698 = vrcp.f32 %v829_v29 }
 0x84f   :  { %v837_v30 = vpop.permute.xlu0 %836 }
 0x850   :  { %v842_v31 = vsel %vm400_vm2, %v837_v30, 0 }
 0x851   :  { %3309 = vmatpush3.bf16.msra.mxu0 %v842_v31 }
 0x852   :  { %v3697_v32 = vpop.eup %3696  ;;  %3320 = vmatprep.subr.bf16.mxu0 %v3767_v50 }
 0x853   :  { %v832_v34 = vmul.f32 %v3697_v32, %v3693_v25  ;;  %v933_v42 = vpop.permute.xlu0 %932  ;;  %v3608_v32 = vld [vmem:[%s4570_s2 + $0x8] ss:$20 sps:$4 sm:$0xff]  }
 0x855   :  { %v834_v35 = vpack.c.bf16 %v832_v34, %v832_v34  ;;  %v3610_v34 = vld [vmem:[%s4570_s2 + $0x58] ss:$20 sps:$4 sm:$0xff]  }
 0x856   :  { %v3699_v37 = vpop.eup %3698 }
 0x857   :  { %v833_v38 = vmul.f32 %v3699_v37, %v3695_v27  ;;  %3311 = vmatmul.mubr.msk.bf16.vlgmr.msra.gmra.mrb[12].mxu0 %vm370_vm3, %v834_v35  ;;  %v3611_v35 = vld [vmem:[%s4570_s2 + $0x80] ss:$20 sps:$4 sm:$0xff]  }
 0x858   :  { %3322 = vmatprep.mubr.msk.bf16.mxu0 %vm3768_vm0, %v3767_v50 }
 0x859   :  { %v835_v40 = vpack.c.bf16 %v833_v38, %v833_v38 }
 0x85a   :  { %3321 = vmatpush3.bf16.xpose.msra.mxu0 %v940_v60 }
 0x85b   :  { %3317 = vmatmul.mubr.msk.bf16.vlgmr.msra.gmra.mrb[32].mxu1 %vm370_vm3, %v835_v40  ;;  %3332 = vmatprep.subr.bf16.mxu0 %v3767_v50 }
 0x85c   :  { %3327 = vmatpush3.bf16.xpose.msra.mxu1 %v990_v41  ;;  %3328 = vmatprep.mubr.msk.bf16.mxu1 %vm3768_vm0, %v3767_v50 }
 0x85d   :  { %3338 = vmatprep.subr.bf16.mxu1 %v3767_v50 }
 0x861   :  { %3323 = vmatmul.mubr.msk.bf16.vlgmr.msra.gmra.mrb[16].mxu0 %vm274_vm1, %v933_v42 }
 0x862   :  { %3334 = vmatprep.mubr.msk.bf16.mxu0 %vm3768_vm0, %v3767_v50 }
 0x863   :  { %3329 = vmatmul.mubr.msk.bf16.vlgmr.msra.gmra.mrb[36].mxu1 %vm274_vm1, %v983_v43 }
 0x864   :  { %3340 = vmatprep.mubr.msk.bf16.mxu1 %vm3768_vm0, %v3767_v50 }
 0x92a   :  { %v878_v44 = vpop.f32.mrb[12].mxu0 }
 0x92b   :  { %v3312_v47 = vpop.f32.mrb[13].mxu0 }
 0x92c   :  { %v881_v52 = vpop.f32.mrb[14].mxu0 }
 0x92d   :  { %v3313_v53 = vpop.f32.mrb[15].mxu0 }
 0x92e   :  { %v926_v56 = vpop.f32.mrb[32].mxu1 }
 0x92f   :  { %v3559_v61 = vpack.i.bf16 %v926_v56, %v878_v44  ;;  %v3318_v62 = vpop.f32.mrb[33].mxu1 }
 0x930   :  { %v929_v63 = vpop.f32.mrb[34].mxu1 }
 0x931   :  { %v3319_v1 = vpop.f32.mrb[35].mxu1 }
 0x934   :  { %v976_v2 = vpop.f32.mrb[16].mxu0 }
 0x935   :  { %v977_v3 = vadd.f32 %v3921_v8, %v976_v2  ;;  %v3324_v4 = vpop.f32.mrb[17].mxu0 }
 0x936   :  { %v979_v5 = vpop.f32.mrb[18].mxu0  ;;  %v1026_v7 = vpop.f32.mrb[36].mxu1 }
 0x937   :  { %v1027_v9 = vadd.f32 %v3928_v15, %v1026_v7  ;;  %v3325_v10 = vpop.f32.mrb[19].mxu0  ;;  %v3330_v11 = vpop.f32.mrb[37].mxu1  ;;  %v1032_v12 = vsel %vm370_vm3, %v977_v3, -inf }
 0x938   :  { %1033 = vmax.xlane.f32.xlu0 %v1032_v12  ;;  %v1029_v13 = vpop.f32.mrb[38].mxu1 }
 0x939   :  { %v3331_v14 = vpop.f32.mrb[39].mxu1  ;;  %v1035_v16 = vsel %vm370_vm3, %v1027_v9, -inf }
 0x93a   :  { %1036 = vmax.xlane.f32.xlu1 %v1035_v16 }
 0x94b   :  { %1104 = vrot.lane.b32.xlu1 %v3944_v36, %s3775_s14 }
 0x94f   :  { %3555 = vrot.lane.b32.xlu1 %v3554_v58, %s3774_s13 }
 0x953   :  { %3560 = vrot.lane.b32.xlu1 %v3559_v61, %s3772_s11 }
 0x9c5   :  { %v1034_v8 = vpop.xlane.xlu0 %1033 }
 0x9c6   :  { %v1038_v15 = vsub.f32 %v977_v3, %v1034_v8 }
 0x9c7   :  { %v1037_v18 = vpop.xlane.xlu1 %1036 }
 0x9c8   :  { %v1040_v19 = vmul.f32 1.442695, %v1038_v15  ;;  %v1039_v20 = vsub.f32 %v1027_v9, %v1037_v18 }
 0x9ca   :  { %3700 = vpow2.f32 %v1040_v19  ;;  %v1042_v21 = vmul.f32 1.442695, %v1039_v20 }
 0x9cb   :  { %v1105_v22 = vpop.permute.xlu1 %1104 }
 0x9cc   :  { %3702 = vpow2.f32 %v1042_v21  ;;  %v1110_v23 = vsel %vm400_vm2, %v1105_v22, 0  ;;  %v3612_v21 = vld [vmem:[%s4570_s2] ss:$20 sps:$4 sm:$0xff]   ;;  %v3615_v22 = vld [vmem:[%s4570_s2 + $0x78] ss:$20 sps:$4 sm:$0xff]  }
 0x9cd   :  { %3339 = vmatpush3.bf16.msra.mxu1 %v1110_v23  ;;  %v3616_v23 = vld [vmem:[%s4570_s2 + $0xa0] ss:$20 sps:$4 sm:$0xff]  }
 0x9ce   :  { %3356 = vmatprep.subr.bf16.mxu1 %v3767_v50 }
 0x9cf   :  { %v3556_v47 = vpop.permute.xlu1 %3555 }
 0x9d0   :  { %v3558_v53 = vunpack.i.h.bf16 %v3556_v47  ;;  %v3557_v56 = vunpack.i.l.bf16 %v3556_v47 }
 0x9d2   :  { %v1177_v1 = vsel %vm274_vm1, %v3967_v59, %v3558_v53  ;;  %v1176_v2 = vsel %vm274_vm1, %v3965_v55, %v3557_v56  ;;  %v119_v55 = vld [vmem:[%s4572_s3 + $0x1] ss:$0 sm:$0xff]  ;;  %v3620_v56 = vld [vmem:[%s4570_s2 + $0x4] ss:$20 sps:$4 sm:$0xff]  }
 0x9d3   :  { %v3561_v52 = vpop.permute.xlu1 %3560 }
 0x9d4   :  { %v3701_v36 = vpop.eup %3700  ;;  %v3563_v61 = vunpack.i.h.bf16 %v3561_v52  ;;  %v3562_v62 = vunpack.i.l.bf16 %v3561_v52 }
 0x9d5   :  { %v1044_v48 = vsel %vm370_vm3, %v3701_v36, 0.0 }
 0x9d6   :  { %v3703_v57 = vpop.eup %3702  ;;  %1045 = vadd.xlane.f32.xlu0 %v1044_v48  ;;  %v1179_v5 = vsel %vm1178_vm4, %v1176_v2, %v3562_v62  ;;  %v1180_v7 = vsel %vm1178_vm4, %v1177_v1, %v3563_v61  ;;  %v3618_v48 = vld [vmem:[%s4570_s2 + $0xf0] ss:$20 sps:$4 sm:$0xff]   ;;  %v3621_v61 = vld [vmem:[%s4570_s2 + $0x2c] ss:$20 sps:$4 sm:$0xff]   ;;  %v3622_v62 = vld [vmem:[%s4570_s2 + $0x54] ss:$20 sps:$4 sm:$0xff]  }
 0x9d7   :  { %v1047_v58 = vsel %vm370_vm3, %v3703_v57, 0.0  ;;  %v3625_v1 = vld [vmem:[%s4570_s2 + $0xcc] ss:$20 sps:$4 sm:$0xff]   ;;  %v3626_v2 = vld [vmem:[%s4570_s2 + $0xf4] ss:$20 sps:$4 sm:$0xff]  }
 0x9da   :  { %1048 = vadd.xlane.f32.xlu0 %v1047_v58 }
 0x9f0   :  { %1056 = vrot.lane.b32.xlu0 %v3909_v6, %s3775_s14 }
 0xa63   :  { %v1046_v24 = vpop.xlane.xlu0 %1045 }
 0xa64   :  { %3704 = vrcp.f32 %v1046_v24 }
 0xa67   :  { %v1049_v25 = vpop.xlane.xlu0 %1048 }
 0xa68   :  { %3706 = vrcp.f32 %v1049_v25 }
 0xa6b   :  { %v1057_v26 = vpop.permute.xlu0 %1056 }
 0xa6c   :  { %v1062_v27 = vsel %vm400_vm2, %v1057_v26, 0 }
 0xa6d   :  { %3333 = vmatpush3.bf16.msra.mxu0 %v1062_v27 }
 0xa6e   :  { %v3705_v0 = vpop.eup %3704  ;;  %3344 = vmatprep.subr.bf16.mxu0 %v3767_v50 }
 0xa6f   :  { %v1052_v28 = vmul.f32 %v3705_v0, %v3701_v36  ;;  %v3617_v36 = vld [vmem:[%s4570_s2 + $0xc8] ss:$20 sps:$4 sm:$0xff]  }
 0xa71   :  { %v1054_v29 = vpack.c.bf16 %v1052_v28, %v1052_v28 }
 0xa72   :  { %v3707_v30 = vpop.eup %3706 }
 0xa73   :  { %v1053_v31 = vmul.f32 %v3707_v30, %v3703_v57  ;;  %3335 = vmatmul.mubr.msk.bf16.vlgmr.msra.gmra.mrb[20].mxu0 %vm370_vm3, %v1054_v29  ;;  %v3619_v57 = vld [vmem:[%s4570_s2 + $0x118] ss:$20 sps:$4 sm:$0xff]  }
 0xa74   :  { %3352 = vmatprep.mubr.msk.bf16.mxu0 %vm3768_vm0, %v3767_v50  ;;  %3345 = vmatpush3.bf16.msra.mxu0 %v3608_v32 }
 0xa75   :  { %v1055_v6 = vpack.c.bf16 %v1053_v31, %v1053_v31  ;;  %3346 = vmatprep.subr.bf16.mxu0 %v3767_v50 }
 0xa77   :  { %3341 = vmatmul.mubr.msk.bf16.vlgmr.msra.gmra.mrb[40].mxu1 %vm370_vm3, %v1055_v6 }
 0xa78   :  { %3372 = vmatprep.mubr.msk.bf16.mxu1 %vm3768_vm0, %v3767_v50  ;;  %3347 = vmatpush3.bf16.msra.mxu0 %v3609_v33 }
 0xa79   :  { %3348 = vmatprep.subr.bf16.mxu0 %v3767_v50  ;;  %3357 = vmatpush3.bf16.msra.mxu1 %v3612_v21 }
 0xa7a   :  { %3358 = vmatprep.subr.bf16.mxu1 %v3767_v50 }
 0xa7c   :  { %3349 = vmatpush3.bf16.msra.mxu0 %v3610_v34 }
 0xa7d   :  { %3350 = vmatprep.subr.bf16.mxu0 %v3767_v50 }
 0xa80   :  { %3351 = vmatpush3.bf16.msra.mxu0 %v3611_v35 }
 0xa81   :  { %3376 = vmatprep.subr.bf16.mxu0 %v3767_v50 }
 0xb46   :  { %v1098_v37 = vpop.f32.mrb[20].mxu0 }
 0xb47   :  { %v3336_v38 = vpop.f32.mrb[21].mxu0 }
 0xb48   :  { %v1101_v39 = vpop.f32.mrb[22].mxu0 }
 0xb49   :  { %v3337_v60 = vpop.f32.mrb[23].mxu0  ;;  %v120_v39 = vld [vmem:[%s4572_s3 + $0x2] ss:$0 sm:$0xff] }
 0xb4a   :  { %v1146_v40 = vpop.f32.mrb[40].mxu1 }
 0xb4b   :  { %v3564_v41 = vpack.i.bf16 %v1146_v40, %v1098_v37  ;;  %v3342_v42 = vpop.f32.mrb[41].mxu1 }
 0xb4c   :  { %v1149_v43 = vpop.f32.mrb[42].mxu1 }
 0xb4d   :  { %3565 = vrot.lane.b32.xlu0 %v3564_v41, %s3770_s9  ;;  %v3343_v44 = vpop.f32.mrb[43].mxu1  ;;  %v121_v43 = vld [vmem:[%s4572_s3 + $0x3] ss:$0 sm:$0xff] }
 0xbbf   :  { %v3566_v63 = vpop.permute.xlu0 %3565 }
 0xbc0   :  { %v3568_v3 = vunpack.i.h.bf16 %v3566_v63  ;;  %v3567_v4 = vunpack.i.l.bf16 %v3566_v63  ;;  %v3624_v63 = vld [vmem:[%s4570_s2 + $0xa4] ss:$20 sps:$4 sm:$0xff]  }
 0xbc2   :  { %v1183_v9 = vsel %vm1181_vm5, %v1180_v7, %v3568_v3  ;;  %v1182_v10 = vsel %vm1181_vm5, %v1179_v5, %v3567_v4  ;;  %v3627_v3 = vld [vmem:[%s4570_s2 + $0x11c] ss:$20 sps:$4 sm:$0xff]   ;;  %v122_v4 = vld [vmem:[%s4572_s3 + $0x4] ss:$0 sm:$0xff] }
 0xbc3   :  { %v1184_v11 = vpack.c.bf16 %v1183_v9, %v1182_v10 }
 0xbc5   :  { %3353 = vmatmul.mubr.msk.bf16.vlgmr.msra.gmra.mrb[24].mxu0 %vm1209_vm6, %v1184_v11 }
 0xbc6   :  { %3392 = vmatprep.mubr.msk.bf16.mxu0 %vm3768_vm0, %v3767_v50  ;;  %3377 = vmatpush3.bf16.msra.mxu0 %v3620_v56  ;;  %v3649_v56 = vld [vmem:[%s4570_s2 + $0x264] ss:$20 sps:$4 sm:$0xff]  }
 0xbc7   :  { %3378 = vmatprep.subr.bf16.mxu0 %v3767_v50 }
 0xbca   :  { %3379 = vmatpush3.bf16.msra.mxu0 %v3621_v61 }
 0xbcb   :  { %3380 = vmatprep.subr.bf16.mxu0 %v3767_v50 }
 0xbce   :  { %3381 = vmatpush3.bf16.msra.mxu0 %v3622_v62 }
 0xbcf   :  { %3382 = vmatprep.subr.bf16.mxu0 %v3767_v50 }
 0xc98   :  { %v1247_v59 = vpop.f32.mrb[24].mxu0 }
 0xc99   :  { %v1248_v12 = vadd.f32 %v1247_v59, %v119_v55  ;;  %v3354_v13 = vpop.f32.mrb[25].mxu0 }
 0xc9a   :  { %v1250_v14 = vpop.f32.mrb[26].mxu0 }
 0xc9b   :  { %v1254_v16 = vadd.f32 %v1248_v12, %v3868_v45  ;;  %v1251_v8 = vadd.f32 %v1250_v14, %v119_v55  ;;  %v3355_v15 = vpop.f32.mrb[27].mxu0  ;;  %v3613_v45 = vld [vmem:[%s4570_s2 + $0x28] ss:$20 sps:$4 sm:$0xff]  }
 0xc9c   :  { %3359 = vmatpush3.bf16.msra.mxu1 %v3613_v45 }
 0xc9d   :  { %v1255_v18 = vadd.f32 %v1251_v8, %v3870_v46  ;;  %1256 = vadd.xlane.f32.xlu1 %v1254_v16  ;;  %v1262_v19 = vmul.f32 %v1254_v16, %v1254_v16  ;;  %3360 = vmatprep.subr.bf16.mxu1 %v3767_v50  ;;  %v3614_v46 = vld [vmem:[%s4570_s2 + $0x50] ss:$20 sps:$4 sm:$0xff]  }
 0xc9f   :  { %1258 = vadd.xlane.f32.xlu0 %v1255_v18  ;;  %v1263_v20 = vmul.f32 %v1255_v18, %v1255_v18 }
 0xca0   :  { %3361 = vmatpush3.bf16.msra.mxu1 %v3614_v46 }
 0xca1   :  { %3362 = vmatprep.subr.bf16.mxu1 %v3767_v50 }
 0xca3   :  { %1264 = vadd.xlane.f32.xlu0 %v1262_v19 }
 0xca4   :  { %3363 = vmatpush3.bf16.msra.mxu1 %v3615_v22 }
 0xca5   :  { %3364 = vmatprep.subr.bf16.mxu1 %v3767_v50 }
 0xca7   :  { %1266 = vadd.xlane.f32.xlu0 %v1263_v20 }
 0xca8   :  { %3365 = vmatpush3.bf16.msra.mxu1 %v3616_v23 }
 0xca9   :  { %3366 = vmatprep.subr.bf16.mxu1 %v3767_v50 }
 0xcac   :  { %3367 = vmatpush3.bf16.msra.mxu1 %v3617_v36 }
 0xcad   :  { %3368 = vmatprep.subr.bf16.mxu1 %v3767_v50 }
 0xcb0   :  { %3369 = vmatpush3.bf16.msra.mxu1 %v3618_v48 }
 0xcb1   :  { %3370 = vmatprep.subr.bf16.mxu1 %v3767_v50 }
 0xcb4   :  { %3371 = vmatpush3.bf16.msra.mxu1 %v3619_v57 }
 0xd2a   :  { %v1257_v58 = vpop.xlane.xlu1 %1256 }
 0xd2b   :  { %v1260_v25 = vmul.f32 0.015625, %v1257_v58 }
 0xd2c   :  { %v1259_v24 = vpop.xlane.xlu0 %1258 }
 0xd2d   :  { %v1270_v27 = vmul.f32 %v1260_v25, %v1260_v25  ;;  %v1261_v0 = vmul.f32 0.015625, %v1259_v24  ;;  %v1274_v35 = vsub.f32 %v1254_v16, %v1260_v25  ;;  %v3628_v24 = vld [vmem:[%s4570_s2 + $0x14c] ss:$20 sps:$4 sm:$0xff]   ;;  %v3630_v25 = vld [vmem:[%s4570_s2 + $0x150] ss:$20 sps:$4 sm:$0xff]  }
 0xd2e   :  { %1674 = vmatprep.subr.bf16.mxu1 %v3630_v25 }
 0xd2f   :  { %v1271_v31 = vmul.f32 %v1261_v0, %v1261_v0  ;;  %v1275_v60 = vsub.f32 %v1255_v18, %v1261_v0 }
 0xd30   :  { %v1265_v26 = vpop.xlane.xlu0 %1264 }
 0xd31   :  { %v1268_v28 = vmul.f32 0.015625, %v1265_v26  ;;  %v123_v26 = vld [vmem:[%s4572_s3 + $0x5] ss:$0 sm:$0xff] }
 0xd33   :  { %v1272_v29 = vsub.f32 %v1268_v28, %v1270_v27 }
 0xd34   :  { %v1267_v30 = vpop.xlane.xlu0 %1266 }
 0xd35   :  { %v1276_v6 = vadd.f32 1e-12, %v1272_v29  ;;  %v1269_v32 = vmul.f32 0.015625, %v1267_v30 }
 0xd37   :  { %3708 = vrsqrt.f32 %v1276_v6  ;;  %v1273_v33 = vsub.f32 %v1269_v32, %v1271_v31 }
 0xd39   :  { %v1277_v34 = vadd.f32 1e-12, %v1273_v33 }
 0xd3b   :  { %3710 = vrsqrt.f32 %v1277_v34 }
 0xd41   :  { %v3709_v37 = vpop.eup %3708 }
 0xd42   :  { %v1280_v38 = vmul.f32 %v3709_v37, %v1274_v35  ;;  %v3633_v35 = vld [vmem:[%s4570_s2 + $0x178] ss:$20 sps:$4 sm:$0xff]   ;;  %v3631_v37 = vld [vmem:[%s4570_s2 + $0x174] ss:$20 sps:$4 sm:$0xff]  }
 0xd44   :  { %v1282_v42 = vmul.f32 %v1280_v38, %v120_v39  ;;  %v3636_v38 = vld [vmem:[%s4570_s2 + $0x1a0] ss:$20 sps:$4 sm:$0xff]  }
 0xd45   :  { %v3711_v40 = vpop.eup %3710 }
 0xd46   :  { %v1281_v41 = vmul.f32 %v3711_v40, %v1275_v60  ;;  %v4146_v47 = vadd.f32 %v1282_v42, %v121_v43  ;;  %v3639_v60 = vld [vmem:[%s4570_s2 + $0x1c8] ss:$20 sps:$4 sm:$0xff]   ;;  %v3637_v40 = vld [vmem:[%s4570_s2 + $0x1c4] ss:$20 sps:$4 sm:$0xff]   ;;  %v3640_v42 = vld [vmem:[%s4570_s2 + $0x1ec] ss:$20 sps:$4 sm:$0xff]  }
 0xd48   :  { %v1283_v44 = vmul.f32 %v1281_v41, %v120_v39  ;;  %v3634_v39 = vld [vmem:[%s4570_s2 + $0x19c] ss:$20 sps:$4 sm:$0xff]  }
 0xd49   :  { %v3642_v41 = vld [vmem:[%s4570_s2 + $0x1f0] ss:$20 sps:$4 sm:$0xff]  }
 0xd4a   :  { %v4148_v52 = vadd.f32 %v1283_v44, %v121_v43  ;;  %v3645_v43 = vld [vmem:[%s4570_s2 + $0x218] ss:$20 sps:$4 sm:$0xff]   ;;  %v3643_v44 = vld [vmem:[%s4570_s2 + $0x214] ss:$20 sps:$4 sm:$0xff]  }
 0xd4c   :  { %v1286_v53 = vpack.c.bf16 %v4148_v52, %v4146_v47 }
 0xd4e   :  { %3373 = vmatmul.mubr.bf16.vlgmr.msra.gmra.mrb[44].mxu1 %v1286_v53  ;;  %v3651_v53 = vld [vmem:[%s4570_s2 + $0x268] ss:$20 sps:$4 sm:$0xff]  }
 0xd4f   :  { %1706 = vmatprep.mubr.bf16.mxu1 %v3766_v17  ;;  %v3623_v17 = vld [vmem:[%s4570_s2 + $0x7c] ss:$20 sps:$4 sm:$0xff]   ;;  %1675 = vmatpush1.bf16.msra.mxu1 %v3628_v24 }
 0xd50   :  { %3383 = vmatpush3.bf16.msra.mxu0 %v3623_v17  ;;  %1676 = vmatprep.subr.bf16.mxu1 %v3633_v35  ;;  %v4298_v35 = vld [vmem:[%s4569_s0 + $0x8] ss:$0 sm:$0xff] }
 0xd51   :  { %3384 = vmatprep.subr.bf16.mxu0 %v3767_v50 }
 0xd53   :  { %1677 = vmatpush1.bf16.msra.mxu1 %v3631_v37 }
 0xd54   :  { %3385 = vmatpush3.bf16.msra.mxu0 %v3624_v63  ;;  %1678 = vmatprep.subr.bf16.mxu1 %v3636_v38 }
 0xd55   :  { %3386 = vmatprep.subr.bf16.mxu0 %v3767_v50 }
 0xd57   :  { %1679 = vmatpush1.bf16.msra.mxu1 %v3634_v39 }
 0xd58   :  { %3387 = vmatpush3.bf16.msra.mxu0 %v3625_v1  ;;  %1680 = vmatprep.subr.bf16.mxu1 %v3639_v60 }
 0xd59   :  { %3388 = vmatprep.subr.bf16.mxu0 %v3767_v50 }
 0xd5b   :  { %1681 = vmatpush1.bf16.msra.mxu1 %v3637_v40 }
 0xd5c   :  { %3389 = vmatpush3.bf16.msra.mxu0 %v3626_v2  ;;  %1682 = vmatprep.subr.bf16.mxu1 %v3642_v41 }
 0xd5d   :  { %3390 = vmatprep.subr.bf16.mxu0 %v3767_v50 }
 0xd5f   :  { %1683 = vmatpush1.bf16.msra.mxu1 %v3640_v42  ;;  %v4305_v42 = vld [vmem:[%s4569_s0 + $0x18] ss:$0 sm:$0xff] }
 0xd60   :  { %3391 = vmatpush3.bf16.msra.mxu0 %v3627_v3  ;;  %1684 = vmatprep.subr.bf16.mxu1 %v3645_v43 }
 0xd61   :  { %3396 = vmatprep.subr.bf16.mxu0 %v3767_v50 }
 0xd63   :  { %1685 = vmatpush1.bf16.msra.mxu1 %v3643_v44 }
 0xe21   :  { %v1369_v5 = vpop.f32.mrb[44].mxu1 }
 0xe22   :  { %v1370_v7 = vadd.f32 %v1369_v5, %v122_v4  ;;  %v3374_v9 = vpop.f32.mrb[45].mxu1 }
 0xe23   :  { %v1372_v10 = vpop.f32.mrb[46].mxu1 }
 0xe24   :  { %v1376_v11 = vmul.f32 %v1370_v7, %v1370_v7  ;;  %v1373_v55 = vadd.f32 %v1372_v10, %v122_v4  ;;  %v3375_v59 = vpop.f32.mrb[47].mxu1 }
 0xe26   :  { %v1378_v12 = vmul.f32 %v1376_v11, %v1370_v7  ;;  %v1377_v13 = vmul.f32 %v1373_v55, %v1373_v55 }
 0xe28   :  { %v1380_v14 = vmul.f32 0.044715, %v1378_v12  ;;  %v1379_v16 = vmul.f32 %v1377_v13, %v1373_v55  ;;  %v124_v13 = vld [vmem:[%s4572_s3 + $0x6] ss:$0 sm:$0xff] }
 0xe2a   :  { %v1382_v8 = vadd.f32 %v1380_v14, %v1370_v7  ;;  %v1381_v15 = vmul.f32 0.044715, %v1379_v16 }
 0xe2c   :  { %v1384_v18 = vmul.f32 0.7978846, %v1382_v8  ;;  %v1383_v19 = vadd.f32 %v1381_v15, %v1373_v55 }
 0xe2e   :  { %3712 = vtanh.f32 %v1384_v18  ;;  %v1385_v20 = vmul.f32 0.7978846, %v1383_v19  ;;  %v125_v19 = vld [vmem:[%s4572_s3 + $0x7] ss:$0 sm:$0xff] }
 0xe30   :  { %3714 = vtanh.f32 %v1385_v20 }
 0xe38   :  { %v3713_v21 = vpop.eup %3712 }
 0xe39   :  { %v1388_v45 = vadd.f32 1.0, %v3713_v21 }
 0xe3a   :  { %v3715_v46 = vpop.eup %3714 }
 0xe3b   :  { %v1390_v22 = vmul.f32 0.5, %v1388_v45  ;;  %v1389_v23 = vadd.f32 1.0, %v3715_v46 }
 0xe3d   :  { %v1391_v36 = vmul.f32 0.5, %v1389_v23  ;;  %v1392_v48 = vmul.f32 %v1390_v22, %v1370_v7  ;;  %v3077_v22 = vld [vmem:[%s4572_s3 + $0x10] ss:$8 sm:$0x3] }
 0xe3e   :  { %v1587_v23 = vrot.slane %v3077_v22, %v130_v51 }
 0xe3f   :  { %v1393_v57 = vmul.f32 %v1391_v36, %v1373_v55  ;;  %v1591_v36 = vrot.slane %v3077_v22, %v134_v54 }
 0xe41   :  { %v1394_v58 = vpack.c.bf16 %v1393_v57, %v1392_v48 }
 0xe43   :  { %3393 = vmatmul.mubr.bf16.vlgmr.msra.gmra.mrb[28].mxu0 %v1394_v58 }
 0xe44   :  { %3398 = vmatprep.mubr.msk.bf16.mxu0 %vm3768_vm0, %v3767_v50 }
 0xf16   :  { %v1477_v27 = vpop.f32.mrb[28].mxu0 }
 0xf17   :  { %v1478_v0 = vadd.f32 %v1477_v27, %v123_v26  ;;  %v3394_v28 = vpop.f32.mrb[29].mxu0 }
 0xf18   :  { %v1480_v29 = vpop.f32.mrb[30].mxu0 }
 0xf19   :  { %v1484_v30 = vadd.f32 %v1478_v0, %v4146_v47  ;;  %v1481_v31 = vadd.f32 %v1480_v29, %v123_v26  ;;  %v3395_v6 = vpop.f32.mrb[31].mxu0  ;;  %v3648_v47 = vld [vmem:[%s4570_s2 + $0x240] ss:$20 sps:$4 sm:$0xff]  }
 0xf1a   :  { %1686 = vmatprep.subr.bf16.mxu1 %v3648_v47 }
 0xf1b   :  { %v1485_v32 = vadd.f32 %v1481_v31, %v4148_v52  ;;  %1486 = vadd.xlane.f32.xlu1 %v1484_v30  ;;  %v1492_v33 = vmul.f32 %v1484_v30, %v1484_v30  ;;  %v3646_v52 = vld [vmem:[%s4570_s2 + $0x23c] ss:$20 sps:$4 sm:$0xff]  }
 0xf1c   :  { %1687 = vmatpush1.bf16.msra.mxu1 %v3646_v52 }
 0xf1d   :  { %1488 = vadd.xlane.f32.xlu0 %v1485_v32  ;;  %v1493_v34 = vmul.f32 %v1485_v32, %v1485_v32  ;;  %1688 = vmatprep.subr.bf16.mxu1 %v3651_v53 }
 0xf1f   :  { %1494 = vadd.xlane.f32.xlu1 %v1492_v33 }
 0xf20   :  { %1689 = vmatpush1.bf16.msra.mxu1 %v3649_v56 }
 0xf21   :  { %1496 = vadd.xlane.f32.xlu0 %v1493_v34  ;;  %3414 = vmatprep.subr.bf16.mxu1 %v3767_v50 }
 0xfa8   :  { %v1487_v61 = vpop.xlane.xlu1 %1486 }
 0xfa9   :  { %v1490_v62 = vmul.f32 0.015625, %v1487_v61 }
 0xfaa   :  { %v1489_v17 = vpop.xlane.xlu0 %1488 }
 0xfab   :  { %v1491_v63 = vmul.f32 0.015625, %v1489_v17  ;;  %v1500_v2 = vmul.f32 %v1490_v62, %v1490_v62  ;;  %v1504_v59 = vsub.f32 %v1484_v30, %v1490_v62 }
 0xfac   :  { %v1495_v1 = vpop.xlane.xlu1 %1494 }
 0xfad   :  { %v1498_v3 = vmul.f32 0.015625, %v1495_v1  ;;  %v1501_v5 = vmul.f32 %v1491_v63, %v1491_v63  ;;  %v1505_v14 = vsub.f32 %v1485_v32, %v1491_v63 }
 0xfae   :  { %v1497_v4 = vpop.xlane.xlu0 %1496 }
 0xfaf   :  { %v1502_v7 = vsub.f32 %v1498_v3, %v1500_v2  ;;  %v1499_v9 = vmul.f32 0.015625, %v1497_v4 }
 0xfb1   :  { %v1506_v10 = vadd.f32 1e-12, %v1502_v7  ;;  %v1503_v11 = vsub.f32 %v1499_v9, %v1501_v5 }
 0xfb3   :  { %3716 = vrsqrt.f32 %v1506_v10  ;;  %v1507_v55 = vadd.f32 1e-12, %v1503_v11 }
 0xfb5   :  { %3718 = vrsqrt.f32 %v1507_v55 }
 0xfbd   :  { %v3717_v12 = vpop.eup %3716 }
 0xfbe   :  { %v1510_v16 = vmul.f32 %v3717_v12, %v1504_v59 }
 0xfbf   :  { %v3719_v8 = vpop.eup %3718 }
 0xfc0   :  { %v1511_v15 = vmul.f32 %v3719_v8, %v1505_v14  ;;  %v1512_v18 = vmul.f32 %v1510_v16, %v124_v13 }
 0xfc2   :  { %v1513_v20 = vmul.f32 %v1511_v15, %v124_v13  ;;  %v4250_v21 = vadd.f32 %v1512_v18, %v125_v19 }
 0xfc4   :  { %v4252_v45 = vadd.f32 %v1513_v20, %v125_v19 }
 0xfc6   :  { %v1582_v46 = vpack.c.bf16 %v4252_v45, %v4250_v21 }
 0xfc8   :  { %1707 = vmatmul.mubr.bf16.vlgmr.msra.gmra.mrb[48].mxu1 %v1582_v46 }
 0xfc9   :  { %3416 = vmatprep.mubr.msk.bf16.mxu1 %vm3768_vm0, %v3767_v50 }
0x109b   :  { %v1708_v48 = vpop.f32.mrb[48].mxu1 }
0x109c   :  { %v1709_v57 = vadd.f32 %v1708_v48, %v1587_v23  ;;  %v1710_v58 = vpop.f32.mrb[49].mxu1 }
0x109d   :  { %v1711_v24 = vadd.f32 %v1710_v58, %v1591_v36  ;;  %v1712_v25 = vpop.f32.mrb[50].mxu1 }
0x109e   :  { %v4265_v26 = vpack.c.bf16 %v1709_v57, %v1709_v57  ;;  %v1713_v27 = vadd.f32 %v1712_v25, %v1587_v23  ;;  %v1714_v0 = vpop.f32.mrb[51].mxu1 }
0x109f   :  { %v1715_v28 = vadd.f32 %v1714_v0, %v1591_v36  ;;  %v4286_v32 = vpack.c.bf16 %v1711_v24, %v1711_v24 }
0x10a0   :  { %v4267_v29 = vpack.c.bf16 %v1713_v27, %v1713_v27  ;;  %1720 = vrot.lane.b32.xlu1 %v4265_v26, %s3769_s30 }
0x10a1   :  { %v4271_v30 = vpack.c.bf16 %v1715_v28, %v1715_v28  ;;  %v1847_v33 = vsel %vm400_vm2, %v4286_v32, 0 }
0x10a2   :  { %1769 = vrot.lane.b32.xlu0 %v4267_v29, %s3769_s30 }
0x10a3   :  { %v1893_v49 = vsel %vm400_vm2, %v4271_v30, 0 }
0x10a4   :  { %3415 = vmatpush3.bf16.msra.mxu1 %v1893_v49 }
0x10a5   :  { %3426 = vmatprep.subr.bf16.mxu1 %v3767_v50 }
0x1112   :  { %v1721_v51 = vpop.permute.xlu1 %1720 }
0x1113   :  { %v1726_v54 = vsel %vm274_vm1, %v1721_v51, 0 }
0x1114   :  { %3397 = vmatpush3.bf16.xpose.msra.mxu0 %v1726_v54  ;;  %v1770_v31 = vpop.permute.xlu0 %1769 }
0x1115   :  { %3402 = vmatprep.subr.bf16.mxu0 %v3767_v50  ;;  %v1775_v6 = vsel %vm274_vm1, %v1770_v31, 0 }
0x111b   :  { %3399 = vmatmul.mubr.msk.bf16.vlgmr.msra.gmra.mrb[32].mxu0 %vm274_vm1, %v4265_v26 }
0x111c   :  { %3403 = vmatpush3.bf16.xpose.msra.mxu0 %v1775_v6  ;;  %3404 = vmatprep.mubr.msk.bf16.mxu0 %vm3768_vm0, %v3767_v50 }
0x111d   :  { %3408 = vmatprep.subr.bf16.mxu0 %v3767_v50 }
0x1123   :  { %3405 = vmatmul.mubr.msk.bf16.vlgmr.msra.gmra.mrb[36].mxu0 %vm274_vm1, %v4267_v29 }
0x1124   :  { %3409 = vmatpush3.bf16.msra.mxu0 %v1847_v33  ;;  %3410 = vmatprep.mubr.msk.bf16.mxu0 %vm3768_vm0, %v3767_v50 }
0x1125   :  { %3420 = vmatprep.subr.bf16.mxu0 %v3767_v50 }
0x11ee   :  { %v1762_v34 = vpop.f32.mrb[32].mxu0 }
0x11ef   :  { %v1763_v37 = vadd.f32 %v4298_v35, %v1762_v34  ;;  %v3400_v38 = vpop.f32.mrb[33].mxu0 }
0x11f0   :  { %v1765_v39 = vpop.f32.mrb[34].mxu0 }
0x11f1   :  { %v3401_v60 = vpop.f32.mrb[35].mxu0  ;;  %v1817_v40 = vsel %vm370_vm3, %v1763_v37, -inf }
0x11f2   :  { %1818 = vmax.xlane.f32.xlu1 %v1817_v40 }
0x11f6   :  { %v1811_v41 = vpop.f32.mrb[36].mxu0 }
0x11f7   :  { %v1812_v43 = vadd.f32 %v4305_v42, %v1811_v41  ;;  %v3406_v44 = vpop.f32.mrb[37].mxu0 }
0x11f8   :  { %v1814_v47 = vpop.f32.mrb[38].mxu0 }
0x11f9   :  { %v3407_v52 = vpop.f32.mrb[39].mxu0  ;;  %v1820_v53 = vsel %vm370_vm3, %v1812_v43, -inf }
0x11fa   :  { %1821 = vmax.xlane.f32.xlu0 %v1820_v53 }
0x1203   :  { %1937 = vrot.lane.b32.xlu1 %v4265_v26, %s3770_s9 }
0x127f   :  { %v1819_v56 = vpop.xlane.xlu1 %1818 }
0x1280   :  { %v1823_v61 = vsub.f32 %v1763_v37, %v1819_v56 }
0x1282   :  { %v1825_v62 = vmul.f32 1.442695, %v1823_v61 }
0x1283   :  { %v1938_v7 = vpop.permute.xlu1 %1937 }
0x1284   :  { %3720 = vpow2.f32 %v1825_v62  ;;  %v1943_v12 = vsel %vm274_vm1, %v1938_v7, 0 }
0x1287   :  { %v1822_v17 = vpop.xlane.xlu0 %1821 }
0x1288   :  { %v1824_v63 = vsub.f32 %v1812_v43, %v1822_v17 }
0x128a   :  { %v1827_v1 = vmul.f32 1.442695, %v1824_v63 }
0x128c   :  { %3722 = vpow2.f32 %v1827_v1 }
0x128e   :  { %v3721_v2 = vpop.eup %3720 }
0x128f   :  { %v1829_v3 = vsel %vm370_vm3, %v3721_v2, 0.0 }
0x1290   :  { %1830 = vadd.xlane.f32.xlu1 %v1829_v3 }
0x1296   :  { %v3723_v4 = vpop.eup %3722 }
0x1297   :  { %v1832_v5 = vsel %vm370_vm3, %v3723_v4, 0.0 }
0x1298   :  { %1833 = vadd.xlane.f32.xlu0 %v1832_v5 }
0x12a1   :  { %1935 = vrot.lane.b32.xlu1 %v4265_v26, %s3771_s10 }
0x12a5   :  { %1985 = vrot.lane.b32.xlu1 %v4267_v29, %s3771_s10 }
0x12ae   :  { %1987 = vrot.lane.b32.xlu0 %v4267_v29, %s3770_s9 }
0x131d   :  { %v1831_v9 = vpop.xlane.xlu1 %1830 }
0x131e   :  { %3724 = vrcp.f32 %v1831_v9 }
0x1321   :  { %v1936_v15 = vpop.permute.xlu1 %1935 }
0x1325   :  { %v1834_v10 = vpop.xlane.xlu0 %1833  ;;  %v1986_v19 = vpop.permute.xlu1 %1985 }
0x1326   :  { %3726 = vrcp.f32 %v1834_v10 }
0x1328   :  { %v3725_v11 = vpop.eup %3724 }
0x1329   :  { %v1837_v55 = vmul.f32 %v3725_v11, %v3721_v2  ;;  %v1988_v16 = vpop.permute.xlu0 %1987 }
0x132a   :  { %v1993_v18 = vsel %vm274_vm1, %v1988_v16, 0 }
0x132b   :  { %v1839_v59 = vpack.c.bf16 %v1837_v55, %v1837_v55 }
0x132d   :  { %3411 = vmatmul.mubr.msk.bf16.vlgmr.msra.gmra.mrb[40].mxu0 %vm370_vm3, %v1839_v59 }
0x132e   :  { %3421 = vmatpush3.bf16.xpose.msra.mxu0 %v1943_v12  ;;  %3422 = vmatprep.mubr.msk.bf16.mxu0 %vm3768_vm0, %v3767_v50 }
0x132f   :  { %3432 = vmatprep.subr.bf16.mxu0 %v3767_v50 }
0x1330   :  { %v3727_v13 = vpop.eup %3726 }
0x1331   :  { %v1838_v14 = vmul.f32 %v3727_v13, %v3723_v4 }
0x1333   :  { %v1840_v8 = vpack.c.bf16 %v1838_v14, %v1838_v14 }
0x1335   :  { %3417 = vmatmul.mubr.msk.bf16.vlgmr.msra.gmra.mrb[52].mxu1 %vm370_vm3, %v1840_v8  ;;  %3423 = vmatmul.mubr.msk.bf16.vlgmr.msra.gmra.mrb[44].mxu0 %vm274_vm1, %v1936_v15 }
0x1336   :  { %3427 = vmatpush3.bf16.xpose.msra.mxu1 %v1993_v18  ;;  %3428 = vmatprep.mubr.msk.bf16.mxu1 %vm3768_vm0, %v3767_v50 }
0x1337   :  { %3438 = vmatprep.subr.bf16.mxu1 %v3767_v50  ;;  %3434 = vmatprep.mubr.msk.bf16.mxu0 %vm3768_vm0, %v3767_v50 }
0x133d   :  { %3429 = vmatmul.mubr.msk.bf16.vlgmr.msra.gmra.mrb[56].mxu1 %vm274_vm1, %v1986_v19 }
0x133e   :  { %3440 = vmatprep.mubr.msk.bf16.mxu1 %vm3768_vm0, %v3767_v50 }
0x1400   :  { %v4335_v20 = vpop.f32.mrb[40].mxu0 }
0x1401   :  { %v3412_v46 = vpop.f32.mrb[41].mxu0 }
0x1402   :  { %v1886_v22 = vpop.f32.mrb[42].mxu0 }
0x1403   :  { %v3413_v23 = vpop.f32.mrb[43].mxu0 }
0x1408   :  { %v4337_v36 = vpop.f32.mrb[52].mxu1  ;;  %v1979_v48 = vpop.f32.mrb[44].mxu0 }
0x1409   :  { %v1980_v57 = vadd.f32 %v4298_v35, %v1979_v48  ;;  %v3418_v58 = vpop.f32.mrb[53].mxu1  ;;  %v3424_v24 = vpop.f32.mrb[45].mxu0 }
0x140a   :  { %v1932_v25 = vpop.f32.mrb[54].mxu1  ;;  %v1982_v27 = vpop.f32.mrb[46].mxu0 }
0x140b   :  { %v3419_v0 = vpop.f32.mrb[55].mxu1  ;;  %v3425_v28 = vpop.f32.mrb[47].mxu0  ;;  %v2035_v49 = vsel %vm370_vm3, %v1980_v57, -inf }
0x140c   :  { %2036 = vmax.xlane.f32.xlu1 %v2035_v49 }
0x1410   :  { %v2029_v51 = vpop.f32.mrb[56].mxu1 }
0x1411   :  { %v2030_v54 = vadd.f32 %v4305_v42, %v2029_v51  ;;  %v3430_v31 = vpop.f32.mrb[57].mxu1 }
0x1412   :  { %v2032_v6 = vpop.f32.mrb[58].mxu1 }
0x1413   :  { %v3431_v33 = vpop.f32.mrb[59].mxu1  ;;  %v2038_v34 = vsel %vm370_vm3, %v2030_v54, -inf }
0x1414   :  { %2039 = vmax.xlane.f32.xlu0 %v2038_v34 }
0x141d   :  { %2060 = vrot.lane.b32.xlu1 %v4286_v32, %s3771_s10 }
0x1421   :  { %2159 = vrot.lane.b32.xlu1 %v4265_v26, %s3772_s11 }
0x1425   :  { %2209 = vrot.lane.b32.xlu1 %v4267_v29, %s3772_s11 }
0x1429   :  { %2157 = vrot.lane.b32.xlu1 %v4265_v26, %s3773_s12 }
0x1499   :  { %v2037_v37 = vpop.xlane.xlu1 %2036 }
0x149a   :  { %v2041_v38 = vsub.f32 %v1980_v57, %v2037_v37 }
0x149c   :  { %v2043_v39 = vmul.f32 1.442695, %v2041_v38 }
0x149d   :  { %v2061_v60 = vpop.permute.xlu1 %2060 }
0x149e   :  { %3728 = vpow2.f32 %v2043_v39  ;;  %v2066_v40 = vsel %vm400_vm2, %v2061_v60, 0 }
0x149f   :  { %3433 = vmatpush3.bf16.msra.mxu0 %v2066_v40 }
0x14a0   :  { %3444 = vmatprep.subr.bf16.mxu0 %v3767_v50 }
0x14a1   :  { %v2040_v41 = vpop.xlane.xlu0 %2039  ;;  %v2160_v63 = vpop.permute.xlu1 %2159 }
0x14a2   :  { %v2042_v43 = vsub.f32 %v2030_v54, %v2040_v41  ;;  %v2165_v5 = vsel %vm274_vm1, %v2160_v63, 0 }
0x14a4   :  { %v2045_v44 = vmul.f32 1.442695, %v2042_v43 }
0x14a5   :  { %v2210_v7 = vpop.permute.xlu1 %2209 }
0x14a6   :  { %3730 = vpow2.f32 %v2045_v44  ;;  %v2215_v59 = vsel %vm274_vm1, %v2210_v7, 0 }
0x14a8   :  { %v3729_v47 = vpop.eup %3728 }
0x14a9   :  { %v2047_v52 = vsel %vm370_vm3, %v3729_v47, 0.0  ;;  %v2158_v55 = vpop.permute.xlu1 %2157 }
0x14aa   :  { %2048 = vadd.xlane.f32.xlu0 %v2047_v52 }
0x14b0   :  { %v3731_v53 = vpop.eup %3730 }
0x14b1   :  { %v2050_v56 = vsel %vm370_vm3, %v3731_v53, 0.0 }
0x14b2   :  { %2051 = vadd.xlane.f32.xlu0 %v2050_v56 }
0x14c8   :  { %2109 = vrot.lane.b32.xlu0 %v4271_v30, %s3771_s10 }
0x14cc   :  { %2207 = vrot.lane.b32.xlu0 %v4267_v29, %s3773_s12 }
0x1537   :  { %v2049_v61 = vpop.xlane.xlu0 %2048 }
0x1538   :  { %3732 = vrcp.f32 %v2049_v61 }
0x153f   :  { %v2052_v62 = vpop.xlane.xlu0 %2051 }
0x1540   :  { %3734 = vrcp.f32 %v2052_v62 }
0x1542   :  { %v3733_v17 = vpop.eup %3732 }
0x1543   :  { %v2055_v1 = vmul.f32 %v3733_v17, %v3729_v47  ;;  %v2110_v2 = vpop.permute.xlu0 %2109 }
0x1544   :  { %v2115_v3 = vsel %vm400_vm2, %v2110_v2, 0 }
0x1545   :  { %3439 = vmatpush3.bf16.msra.mxu1 %v2115_v3  ;;  %v2057_v4 = vpack.c.bf16 %v2055_v1, %v2055_v1 }
0x1546   :  { %3450 = vmatprep.subr.bf16.mxu1 %v3767_v50 }
0x1547   :  { %3435 = vmatmul.mubr.msk.bf16.vlgmr.msra.gmra.mrb[48].mxu0 %vm370_vm3, %v2057_v4  ;;  %v2208_v12 = vpop.permute.xlu0 %2207 }
0x1548   :  { %3445 = vmatpush3.bf16.xpose.msra.mxu0 %v2165_v5  ;;  %3446 = vmatprep.mubr.msk.bf16.mxu0 %vm3768_vm0, %v3767_v50 }
0x1549   :  { %3456 = vmatprep.subr.bf16.mxu0 %v3767_v50 }
0x154a   :  { %v3735_v9 = vpop.eup %3734 }
0x154b   :  { %v2056_v10 = vmul.f32 %v3735_v9, %v3731_v53 }
0x154d   :  { %v2058_v11 = vpack.c.bf16 %v2056_v10, %v2056_v10 }
0x154f   :  { %3441 = vmatmul.mubr.msk.bf16.vlgmr.msra.gmra.mrb[60].mxu1 %vm370_vm3, %v2058_v11  ;;  %3447 = vmatmul.mubr.msk.bf16.vlgmr.msra.gmra.mrb[52].mxu0 %vm274_vm1, %v2158_v55 }
0x1550   :  { %3451 = vmatpush3.bf16.xpose.msra.mxu1 %v2215_v59  ;;  %3452 = vmatprep.mubr.msk.bf16.mxu1 %vm3768_vm0, %v3767_v50 }
0x1551   :  { %3462 = vmatprep.subr.bf16.mxu1 %v3767_v50  ;;  %3458 = vmatprep.mubr.msk.bf16.mxu0 %vm3768_vm0, %v3767_v50 }
0x1557   :  { %3453 = vmatmul.mubr.msk.bf16.vlgmr.msra.gmra.mrb[64].mxu1 %vm274_vm1, %v2208_v12 }
0x1558   :  { %3464 = vmatprep.mubr.msk.bf16.mxu1 %vm3768_vm0, %v3767_v50 }
0x161a   :  { %v4377_v13 = vpop.f32.mrb[48].mxu0 }
0x161b   :  { %v3436_v14 = vpop.f32.mrb[49].mxu0 }
0x161c   :  { %v2105_v16 = vpop.f32.mrb[50].mxu0 }
0x161d   :  { %v3437_v8 = vpop.f32.mrb[51].mxu0 }
0x1622   :  { %v4379_v15 = vpop.f32.mrb[60].mxu1  ;;  %v2201_v18 = vpop.f32.mrb[52].mxu0 }
0x1623   :  { %v3569_v19 = vpack.i.bf16 %v4379_v15, %v4377_v13  ;;  %v2202_v46 = vadd.f32 %v4298_v35, %v2201_v18  ;;  %v3442_v22 = vpop.f32.mrb[61].mxu1  ;;  %v3448_v23 = vpop.f32.mrb[53].mxu0 }
0x1624   :  { %v2154_v48 = vpop.f32.mrb[62].mxu1  ;;  %v2204_v57 = vpop.f32.mrb[54].mxu0 }
0x1625   :  { %v3443_v58 = vpop.f32.mrb[63].mxu1  ;;  %v3449_v24 = vpop.f32.mrb[55].mxu0  ;;  %v2257_v25 = vsel %vm370_vm3, %v2202_v46, -inf }
0x1626   :  { %2258 = vmax.xlane.f32.xlu1 %v2257_v25 }
0x162a   :  { %v2251_v27 = vpop.f32.mrb[64].mxu1 }
0x162b   :  { %v2252_v0 = vadd.f32 %v4305_v42, %v2251_v27  ;;  %v3454_v28 = vpop.f32.mrb[65].mxu1 }
0x162c   :  { %v2254_v49 = vpop.f32.mrb[66].mxu1 }
0x162d   :  { %v3455_v51 = vpop.f32.mrb[67].mxu1  ;;  %v2260_v54 = vsel %vm370_vm3, %v2252_v0, -inf }
0x162e   :  { %2261 = vmax.xlane.f32.xlu0 %v2260_v54 }
0x1637   :  { %2281 = vrot.lane.b32.xlu1 %v4286_v32, %s3773_s12 }
0x163b   :  { %2379 = vrot.lane.b32.xlu1 %v4265_v26, %s3774_s13 }
0x163f   :  { %2429 = vrot.lane.b32.xlu1 %v4267_v29, %s3774_s13 }
0x1643   :  { %2377 = vrot.lane.b32.xlu1 %v4265_v26, %s3775_s14 }
0x16b3   :  { %v2259_v31 = vpop.xlane.xlu1 %2258 }
0x16b4   :  { %v2263_v6 = vsub.f32 %v2202_v46, %v2259_v31 }
0x16b6   :  { %v2265_v33 = vmul.f32 1.442695, %v2263_v6 }
0x16b7   :  { %v2282_v34 = vpop.permute.xlu1 %2281 }
0x16b8   :  { %3736 = vpow2.f32 %v2265_v33  ;;  %v2287_v37 = vsel %vm400_vm2, %v2282_v34, 0 }
0x16b9   :  { %3457 = vmatpush3.bf16.msra.mxu0 %v2287_v37 }
0x16ba   :  { %3468 = vmatprep.subr.bf16.mxu0 %v3767_v50 }
0x16bb   :  { %v2262_v38 = vpop.xlane.xlu0 %2261  ;;  %v2380_v53 = vpop.permute.xlu1 %2379 }
0x16bc   :  { %v2264_v39 = vsub.f32 %v2252_v0, %v2262_v38  ;;  %v2385_v63 = vsel %vm274_vm1, %v2380_v53, 0  ;;  %v3655_v53 = vld [vmem:[%s4570_s2 + $0x1c0] ss:$20 sps:$4 sm:$0xff]  }
0x16be   :  { %v2267_v60 = vmul.f32 1.442695, %v2264_v39 }
0x16bf   :  { %v2430_v1 = vpop.permute.xlu1 %2429 }
0x16c0   :  { %3738 = vpow2.f32 %v2267_v60  ;;  %v2435_v5 = vsel %vm274_vm1, %v2430_v1, 0 }
0x16c2   :  { %v3737_v40 = vpop.eup %3736 }
0x16c3   :  { %v2269_v41 = vsel %vm370_vm3, %v3737_v40, 0.0  ;;  %v2378_v4 = vpop.permute.xlu1 %2377 }
0x16c4   :  { %2270 = vadd.xlane.f32.xlu0 %v2269_v41 }
0x16ca   :  { %v3739_v43 = vpop.eup %3738 }
0x16cb   :  { %v2272_v26 = vsel %vm370_vm3, %v3739_v43, 0.0 }
0x16cc   :  { %2273 = vadd.xlane.f32.xlu0 %v2272_v26 }
0x16e2   :  { %2329 = vrot.lane.b32.xlu0 %v4271_v30, %s3773_s12 }
0x16e6   :  { %2427 = vrot.lane.b32.xlu0 %v4267_v29, %s3775_s14 }
0x1751   :  { %v2271_v44 = vpop.xlane.xlu0 %2270 }
0x1752   :  { %3740 = vrcp.f32 %v2271_v44  ;;  %v3652_v44 = vld [vmem:[%s4570_s2 + $0x148] ss:$20 sps:$4 sm:$0xff]  }
0x1759   :  { %v2274_v47 = vpop.xlane.xlu0 %2273 }
0x175a   :  { %3742 = vrcp.f32 %v2274_v47  ;;  %v3653_v47 = vld [vmem:[%s4570_s2 + $0x170] ss:$20 sps:$4 sm:$0xff]  }
0x175c   :  { %v3741_v52 = vpop.eup %3740 }
0x175d   :  { %v2277_v56 = vmul.f32 %v3741_v52, %v3737_v40  ;;  %v2330_v61 = vpop.permute.xlu0 %2329  ;;  %v3654_v52 = vld [vmem:[%s4570_s2 + $0x198] ss:$20 sps:$4 sm:$0xff]  }
0x175e   :  { %v2335_v62 = vsel %vm400_vm2, %v2330_v61, 0 }
0x175f   :  { %3463 = vmatpush3.bf16.msra.mxu1 %v2335_v62  ;;  %v2279_v17 = vpack.c.bf16 %v2277_v56, %v2277_v56 }
0x1760   :  { %3474 = vmatprep.subr.bf16.mxu1 %v3767_v50 }
0x1761   :  { %3459 = vmatmul.mubr.msk.bf16.vlgmr.msra.gmra.mrb[56].mxu0 %vm370_vm3, %v2279_v17  ;;  %v2428_v7 = vpop.permute.xlu0 %2427 }
0x1762   :  { %3469 = vmatpush3.bf16.xpose.msra.mxu0 %v2385_v63  ;;  %3470 = vmatprep.mubr.msk.bf16.mxu0 %vm3768_vm0, %v3767_v50 }
0x1763   :  { %3480 = vmatprep.subr.bf16.mxu0 %v3767_v50 }
0x1764   :  { %v3743_v29 = vpop.eup %3742 }
0x1765   :  { %v2278_v2 = vmul.f32 %v3743_v29, %v3739_v43 }
0x1767   :  { %v2280_v3 = vpack.c.bf16 %v2278_v2, %v2278_v2 }
0x1769   :  { %3465 = vmatmul.mubr.msk.bf16.vlgmr.msra.gmra.mrb[68].mxu1 %vm370_vm3, %v2280_v3  ;;  %3471 = vmatmul.mubr.msk.bf16.vlgmr.msra.gmra.mrb[60].mxu0 %vm274_vm1, %v2378_v4 }
0x176a   :  { %3475 = vmatpush3.bf16.xpose.msra.mxu1 %v2435_v5  ;;  %3476 = vmatprep.mubr.msk.bf16.mxu1 %vm3768_vm0, %v3767_v50 }
0x176b   :  { %3486 = vmatprep.subr.bf16.mxu1 %v3767_v50  ;;  %3482 = vmatprep.mubr.msk.bf16.mxu0 %vm3768_vm0, %v3767_v50 }
0x1771   :  { %3477 = vmatmul.mubr.msk.bf16.vlgmr.msra.gmra.mrb[72].mxu1 %vm274_vm1, %v2428_v7 }
0x1772   :  { %3488 = vmatprep.mubr.msk.bf16.mxu1 %vm3768_vm0, %v3767_v50 }
0x1834   :  { %v2323_v9 = vpop.f32.mrb[56].mxu0 }
0x1835   :  { %v3460_v10 = vpop.f32.mrb[57].mxu0 }
0x1836   :  { %v2326_v11 = vpop.f32.mrb[58].mxu0 }
0x1837   :  { %v3461_v55 = vpop.f32.mrb[59].mxu0 }
0x183c   :  { %v2371_v59 = vpop.f32.mrb[68].mxu1  ;;  %v2421_v12 = vpop.f32.mrb[60].mxu0 }
0x183d   :  { %v3574_v14 = vpack.i.bf16 %v2371_v59, %v2323_v9  ;;  %v2422_v16 = vadd.f32 %v4298_v35, %v2421_v12  ;;  %v3466_v8 = vpop.f32.mrb[69].mxu1  ;;  %v3472_v18 = vpop.f32.mrb[61].mxu0 }
0x183e   :  { %v2374_v46 = vpop.f32.mrb[70].mxu1  ;;  %v2424_v22 = vpop.f32.mrb[62].mxu0 }
0x183f   :  { %v3467_v23 = vpop.f32.mrb[71].mxu1  ;;  %v3473_v48 = vpop.f32.mrb[63].mxu0  ;;  %v2477_v57 = vsel %vm370_vm3, %v2422_v16, -inf }
0x1840   :  { %2478 = vmax.xlane.f32.xlu1 %v2477_v57 }
0x1844   :  { %v2471_v58 = vpop.f32.mrb[72].mxu1 }
0x1845   :  { %v2472_v24 = vadd.f32 %v4305_v42, %v2471_v58  ;;  %v3478_v25 = vpop.f32.mrb[73].mxu1 }
0x1846   :  { %v2474_v27 = vpop.f32.mrb[74].mxu1 }
0x1847   :  { %v3479_v0 = vpop.f32.mrb[75].mxu1  ;;  %v2480_v28 = vsel %vm370_vm3, %v2472_v24, -inf }
0x1848   :  { %2481 = vmax.xlane.f32.xlu0 %v2480_v28 }
0x1851   :  { %2501 = vrot.lane.b32.xlu1 %v4286_v32, %s3775_s14 }
0x1855   :  { %3570 = vrot.lane.b32.xlu1 %v3569_v19, %s3774_s13 }
0x1859   :  { %3575 = vrot.lane.b32.xlu1 %v3574_v14, %s3772_s11 }
0x18cd   :  { %v2479_v35 = vpop.xlane.xlu1 %2478 }
0x18ce   :  { %v2483_v49 = vsub.f32 %v2422_v16, %v2479_v35 }
0x18d0   :  { %v2485_v51 = vmul.f32 1.442695, %v2483_v49  ;;  %v3656_v49 = vld [vmem:[%s4570_s2 + $0x140] ss:$20 sps:$4 sm:$0xff]  }
0x18d1   :  { %v2502_v42 = vpop.permute.xlu1 %2501 }
0x18d2   :  { %3744 = vpow2.f32 %v2485_v51  ;;  %v2507_v54 = vsel %vm400_vm2, %v2502_v42, 0  ;;  %v3659_v51 = vld [vmem:[%s4570_s2 + $0x1b8] ss:$20 sps:$4 sm:$0xff]   ;;  %v3660_v42 = vld [vmem:[%s4570_s2 + $0x1e0] ss:$20 sps:$4 sm:$0xff]  }
0x18d3   :  { %3481 = vmatpush3.bf16.msra.mxu0 %v2507_v54  ;;  %v3661_v54 = vld [vmem:[%s4570_s2 + $0x208] ss:$20 sps:$4 sm:$0xff]  }
0x18d4   :  { %3492 = vmatprep.subr.bf16.mxu0 %v3767_v50 }
0x18d5   :  { %v2482_v31 = vpop.xlane.xlu0 %2481  ;;  %v3571_v4 = vpop.permute.xlu1 %3570 }
0x18d6   :  { %v2484_v6 = vsub.f32 %v2472_v24, %v2482_v31  ;;  %v3573_v7 = vunpack.i.h.bf16 %v3571_v4  ;;  %v3572_v9 = vunpack.i.l.bf16 %v3571_v4  ;;  %v3662_v31 = vld [vmem:[%s4570_s2 + $0x230] ss:$20 sps:$4 sm:$0xff]   ;;  %v3665_v4 = vld [vmem:[%s4570_s2 + $0x16c] ss:$20 sps:$4 sm:$0xff]  }
0x18d8   :  { %v2487_v32 = vmul.f32 1.442695, %v2484_v6  ;;  %v2622_v59 = vsel %vm274_vm1, %v4337_v36, %v3573_v7  ;;  %v2621_v12 = vsel %vm274_vm1, %v4335_v20, %v3572_v9  ;;  %v3078_v20 = vld [vmem:[%s4572_s3 + $0x11] ss:$0 sm:$0xff]  ;;  %v3663_v6 = vld [vmem:[%s4570_s2 + $0x258] ss:$20 sps:$4 sm:$0xff]  }
0x18d9   :  { %v3576_v5 = vpop.permute.xlu1 %3575  ;;  %v3667_v7 = vld [vmem:[%s4570_s2 + $0x1bc] ss:$20 sps:$4 sm:$0xff]   ;;  %v3668_v9 = vld [vmem:[%s4570_s2 + $0x1e4] ss:$20 sps:$4 sm:$0xff]  }
0x18da   :  { %3746 = vpow2.f32 %v2487_v32  ;;  %v3578_v10 = vunpack.i.h.bf16 %v3576_v5  ;;  %v3577_v11 = vunpack.i.l.bf16 %v3576_v5  ;;  %v3666_v5 = vld [vmem:[%s4570_s2 + $0x194] ss:$20 sps:$4 sm:$0xff]  }
0x18dc   :  { %v3745_v33 = vpop.eup %3744  ;;  %v2623_v8 = vsel %vm1178_vm4, %v2621_v12, %v3577_v11  ;;  %v2624_v18 = vsel %vm1178_vm4, %v2622_v59, %v3578_v10  ;;  %v3669_v10 = vld [vmem:[%s4570_s2 + $0x20c] ss:$20 sps:$4 sm:$0xff]   ;;  %v3670_v11 = vld [vmem:[%s4570_s2 + $0x234] ss:$20 sps:$4 sm:$0xff]  }
0x18dd   :  { %v2489_v13 = vsel %vm370_vm3, %v3745_v33, 0.0  ;;  %v3081_v59 = vld [vmem:[%s4572_s3 + $0x14] ss:$0 sm:$0xff] }
0x18de   :  { %2490 = vadd.xlane.f32.xlu0 %v2489_v13 }
0x18e4   :  { %v3747_v15 = vpop.eup %3746 }
0x18e5   :  { %v2492_v19 = vsel %vm370_vm3, %v3747_v15, 0.0 }
0x18e6   :  { %2493 = vadd.xlane.f32.xlu0 %v2492_v19 }
0x18fc   :  { %2549 = vrot.lane.b32.xlu0 %v4271_v30, %s3775_s14 }
0x196b   :  { %v2491_v34 = vpop.xlane.xlu0 %2490 }
0x196c   :  { %3748 = vrcp.f32 %v2491_v34 }
0x1973   :  { %v2494_v37 = vpop.xlane.xlu0 %2493 }
0x1974   :  { %3750 = vrcp.f32 %v2494_v37 }
0x1976   :  { %v3749_v38 = vpop.eup %3748 }
0x1977   :  { %v2497_v39 = vmul.f32 %v3749_v38, %v3745_v33  ;;  %v2550_v60 = vpop.permute.xlu0 %2549 }
0x1978   :  { %v2555_v40 = vsel %vm400_vm2, %v2550_v60, 0 }
0x1979   :  { %3487 = vmatpush3.bf16.msra.mxu1 %v2555_v40  ;;  %v2499_v41 = vpack.c.bf16 %v2497_v39, %v2497_v39 }
0x197a   :  { %3504 = vmatprep.subr.bf16.mxu1 %v3767_v50 }
0x197b   :  { %3483 = vmatmul.mubr.msk.bf16.vlgmr.msra.gmra.mrb[64].mxu0 %vm370_vm3, %v2499_v41 }
0x197c   :  { %3500 = vmatprep.mubr.msk.bf16.mxu0 %vm3768_vm0, %v3767_v50  ;;  %3493 = vmatpush3.bf16.msra.mxu0 %v3652_v44 }
0x197d   :  { %3494 = vmatprep.subr.bf16.mxu0 %v3767_v50 }
0x197e   :  { %v3751_v43 = vpop.eup %3750 }
0x197f   :  { %v2498_v30 = vmul.f32 %v3751_v43, %v3747_v15 }
0x1980   :  { %3495 = vmatpush3.bf16.msra.mxu0 %v3653_v47 }
0x1981   :  { %v2500_v26 = vpack.c.bf16 %v2498_v30, %v2498_v30  ;;  %3496 = vmatprep.subr.bf16.mxu0 %v3767_v50 }
0x1983   :  { %3489 = vmatmul.mubr.msk.bf16.vlgmr.msra.gmra.mrb[76].mxu1 %vm370_vm3, %v2500_v26 }
0x1984   :  { %3520 = vmatprep.mubr.msk.bf16.mxu1 %vm3768_vm0, %v3767_v50  ;;  %3497 = vmatpush3.bf16.msra.mxu0 %v3654_v52  ;;  %v3079_v52 = vld [vmem:[%s4572_s3 + $0x12] ss:$0 sm:$0xff] }
0x1985   :  { %3498 = vmatprep.subr.bf16.mxu0 %v3767_v50  ;;  %3505 = vmatpush3.bf16.msra.mxu1 %v3656_v49 }
0x1986   :  { %3506 = vmatprep.subr.bf16.mxu1 %v3767_v50 }
0x1988   :  { %3499 = vmatpush3.bf16.msra.mxu0 %v3655_v53 }
0x1989   :  { %3524 = vmatprep.subr.bf16.mxu0 %v3767_v50 }
0x1a4e   :  { %v2543_v56 = vpop.f32.mrb[64].mxu0 }
0x1a4f   :  { %v3484_v61 = vpop.f32.mrb[65].mxu0 }
0x1a50   :  { %v2546_v62 = vpop.f32.mrb[66].mxu0 }
0x1a51   :  { %v3485_v17 = vpop.f32.mrb[67].mxu0 }
0x1a52   :  { %v3080_v17 = vld [vmem:[%s4572_s3 + $0x13] ss:$0 sm:$0xff] }
0x1a56   :  { %v2591_v63 = vpop.f32.mrb[76].mxu1 }
0x1a57   :  { %v3579_v1 = vpack.i.bf16 %v2591_v63, %v2543_v56  ;;  %v3490_v29 = vpop.f32.mrb[77].mxu1 }
0x1a58   :  { %v2594_v2 = vpop.f32.mrb[78].mxu1 }
0x1a59   :  { %v3491_v3 = vpop.f32.mrb[79].mxu1  ;;  %3580 = vrot.lane.b32.xlu1 %v3579_v1, %s3770_s9 }
0x1a5a   :  { %v3664_v3 = vld [vmem:[%s4570_s2 + $0x144] ss:$20 sps:$4 sm:$0xff]  }
0x1acb   :  { %v3581_v55 = vpop.permute.xlu1 %3580 }
0x1acc   :  { %v3583_v14 = vunpack.i.h.bf16 %v3581_v55  ;;  %v3582_v16 = vunpack.i.l.bf16 %v3581_v55  ;;  %v3671_v55 = vld [vmem:[%s4570_s2 + $0x25c] ss:$20 sps:$4 sm:$0xff]  }
0x1ace   :  { %v2626_v46 = vsel %vm1181_vm5, %v2624_v18, %v3583_v14  ;;  %v2625_v22 = vsel %vm1181_vm5, %v2623_v8, %v3582_v16 }
0x1acf   :  { %v2627_v23 = vpack.c.bf16 %v2626_v46, %v2625_v22 }
0x1ad1   :  { %3501 = vmatmul.mubr.msk.bf16.vlgmr.msra.gmra.mrb[68].mxu0 %vm1209_vm6, %v2627_v23 }
0x1ad2   :  { %3540 = vmatprep.mubr.msk.bf16.mxu0 %vm3768_vm0, %v3767_v50  ;;  %3525 = vmatpush3.bf16.msra.mxu0 %v3664_v3 }
0x1ad3   :  { %3526 = vmatprep.subr.bf16.mxu0 %v3767_v50 }
0x1ad6   :  { %3527 = vmatpush3.bf16.msra.mxu0 %v3665_v4  ;;  %v3084_v4 = vld [vmem:[%s4572_s3 + $0x17] ss:$0 sm:$0xff] }
0x1ad7   :  { %3528 = vmatprep.subr.bf16.mxu0 %v3767_v50 }
0x1ada   :  { %3529 = vmatpush3.bf16.msra.mxu0 %v3666_v5 }
0x1adb   :  { %3530 = vmatprep.subr.bf16.mxu0 %v3767_v50 }
0x1ade   :  { %3531 = vmatpush3.bf16.msra.mxu0 %v3667_v7 }
0x1adf   :  { %3532 = vmatprep.subr.bf16.mxu0 %v3767_v50 }
0x1ae2   :  { %3533 = vmatpush3.bf16.msra.mxu0 %v3668_v9 }
0x1ae3   :  { %3534 = vmatprep.subr.bf16.mxu0 %v3767_v50 }
0x1ae6   :  { %3535 = vmatpush3.bf16.msra.mxu0 %v3669_v10 }
0x1ae7   :  { %3536 = vmatprep.subr.bf16.mxu0 %v3767_v50 }
0x1aea   :  { %3537 = vmatpush3.bf16.msra.mxu0 %v3670_v11 }
0x1aeb   :  { %3538 = vmatprep.subr.bf16.mxu0 %v3767_v50 }
0x1aee   :  { %3539 = vmatpush3.bf16.msra.mxu0 %v3671_v55 }
0x1ba4   :  { %v2689_v36 = vpop.f32.mrb[68].mxu0 }
0x1ba5   :  { %v2690_v48 = vadd.f32 %v3078_v20, %v2689_v36  ;;  %v3502_v57 = vpop.f32.mrb[69].mxu0 }
0x1ba6   :  { %v2692_v58 = vpop.f32.mrb[70].mxu0 }
0x1ba7   :  { %v2696_v24 = vadd.f32 %v2690_v48, %v4250_v21  ;;  %v2693_v25 = vadd.f32 %v3078_v20, %v2692_v58  ;;  %v3503_v27 = vpop.f32.mrb[71].mxu0  ;;  %v3657_v21 = vld [vmem:[%s4570_s2 + $0x168] ss:$20 sps:$4 sm:$0xff]  }
0x1ba8   :  { %3507 = vmatpush3.bf16.msra.mxu1 %v3657_v21 }
0x1ba9   :  { %v2697_v0 = vadd.f32 %v2693_v25, %v4252_v45  ;;  %2698 = vadd.xlane.f32.xlu0 %v2696_v24  ;;  %v2704_v28 = vmul.f32 %v2696_v24, %v2696_v24  ;;  %3508 = vmatprep.subr.bf16.mxu1 %v3767_v50  ;;  %v3658_v45 = vld [vmem:[%s4570_s2 + $0x190] ss:$20 sps:$4 sm:$0xff]  }
0x1bab   :  { %2700 = vadd.xlane.f32.xlu1 %v2697_v0  ;;  %v2705_v35 = vmul.f32 %v2697_v0, %v2697_v0 }
0x1bac   :  { %3509 = vmatpush3.bf16.msra.mxu1 %v3658_v45 }
0x1bad   :  { %2706 = vadd.xlane.f32.xlu0 %v2704_v28  ;;  %3510 = vmatprep.subr.bf16.mxu1 %v3767_v50 }
0x1bb0   :  { %3511 = vmatpush3.bf16.msra.mxu1 %v3659_v51 }
0x1bb1   :  { %2708 = vadd.xlane.f32.xlu0 %v2705_v35  ;;  %3512 = vmatprep.subr.bf16.mxu1 %v3767_v50 }
0x1bb4   :  { %3513 = vmatpush3.bf16.msra.mxu1 %v3660_v42 }
0x1bb5   :  { %3514 = vmatprep.subr.bf16.mxu1 %v3767_v50 }
0x1bb8   :  { %3515 = vmatpush3.bf16.msra.mxu1 %v3661_v54  ;;  %v3082_v54 = vld [vmem:[%s4572_s3 + $0x15] ss:$0 sm:$0xff] }
0x1bb9   :  { %3516 = vmatprep.subr.bf16.mxu1 %v3767_v50 }
0x1bbc   :  { %3517 = vmatpush3.bf16.msra.mxu1 %v3662_v31 }
0x1bbd   :  { %3518 = vmatprep.subr.bf16.mxu1 %v3767_v50 }
0x1bc0   :  { %3519 = vmatpush3.bf16.msra.mxu1 %v3663_v6 }
0x1c36   :  { %v2699_v32 = vpop.xlane.xlu0 %2698 }
0x1c37   :  { %v2702_v33 = vmul.f32 0.015625, %v2699_v32 }
0x1c38   :  { %v2701_v13 = vpop.xlane.xlu1 %2700 }
0x1c39   :  { %v2712_v19 = vmul.f32 %v2702_v33, %v2702_v33  ;;  %v2703_v34 = vmul.f32 0.015625, %v2701_v13  ;;  %v2716_v26 = vsub.f32 %v2696_v24, %v2702_v33 }
0x1c3a   :  { %v2707_v15 = vpop.xlane.xlu0 %2706 }
0x1c3b   :  { %v2710_v37 = vmul.f32 0.015625, %v2707_v15  ;;  %v2713_v60 = vmul.f32 %v2703_v34, %v2703_v34  ;;  %v2717_v53 = vsub.f32 %v2697_v0, %v2703_v34 }
0x1c3d   :  { %v2714_v38 = vsub.f32 %v2710_v37, %v2712_v19 }
0x1c3e   :  { %v2709_v39 = vpop.xlane.xlu0 %2708 }
0x1c3f   :  { %v2718_v40 = vadd.f32 1e-12, %v2714_v38  ;;  %v2711_v41 = vmul.f32 0.015625, %v2709_v39 }
0x1c41   :  { %3752 = vrsqrt.f32 %v2718_v40  ;;  %v2715_v43 = vsub.f32 %v2711_v41, %v2713_v60 }
0x1c43   :  { %v2719_v30 = vadd.f32 1e-12, %v2715_v43 }
0x1c45   :  { %3754 = vrsqrt.f32 %v2719_v30 }
0x1c4b   :  { %v3753_v44 = vpop.eup %3752 }
0x1c4c   :  { %v2722_v47 = vmul.f32 %v3753_v44, %v2716_v26 }
0x1c4e   :  { %v2724_v62 = vmul.f32 %v3079_v52, %v2722_v47 }
0x1c4f   :  { %v3755_v56 = vpop.eup %3754 }
0x1c50   :  { %v2723_v61 = vmul.f32 %v3755_v56, %v2717_v53  ;;  %v2726_v1 = vadd.f32 %v3080_v17, %v2724_v62 }
0x1c52   :  { %v2725_v63 = vmul.f32 %v3079_v52, %v2723_v61 }
0x1c54   :  { %v4516_v29 = vadd.f32 %v3080_v17, %v2725_v63 }
0x1c56   :  { %v2728_v2 = vpack.c.bf16 %v4516_v29, %v2726_v1 }
0x1c58   :  { %3521 = vmatmul.mubr.bf16.vlgmr.msra.gmra.mrb[80].mxu1 %v2728_v2 }
0x1d2b   :  { %v2811_v12 = vpop.f32.mrb[80].mxu1 }
0x1d2c   :  { %v2812_v14 = vadd.f32 %v3081_v59, %v2811_v12  ;;  %v3522_v16 = vpop.f32.mrb[81].mxu1 }
0x1d2d   :  { %v2814_v8 = vpop.f32.mrb[82].mxu1 }
0x1d2e   :  { %v2818_v18 = vmul.f32 %v2812_v14, %v2812_v14  ;;  %v2815_v46 = vadd.f32 %v3081_v59, %v2814_v8  ;;  %v3523_v22 = vpop.f32.mrb[83].mxu1 }
0x1d30   :  { %v2820_v23 = vmul.f32 %v2818_v18, %v2812_v14  ;;  %v2819_v20 = vmul.f32 %v2815_v46, %v2815_v46 }
0x1d32   :  { %v2822_v36 = vmul.f32 0.044715, %v2820_v23  ;;  %v2821_v50 = vmul.f32 %v2819_v20, %v2815_v46 }
0x1d34   :  { %v2824_v48 = vadd.f32 %v2822_v36, %v2812_v14  ;;  %v2823_v57 = vmul.f32 0.044715, %v2821_v50 }
0x1d36   :  { %v2826_v58 = vmul.f32 0.7978846, %v2824_v48  ;;  %v2825_v24 = vadd.f32 %v2823_v57, %v2815_v46 }
0x1d38   :  { %3756 = vtanh.f32 %v2826_v58  ;;  %v2827_v25 = vmul.f32 0.7978846, %v2825_v24 }
0x1d3a   :  { %3758 = vtanh.f32 %v2827_v25 }
0x1d42   :  { %v3757_v27 = vpop.eup %3756 }
0x1d43   :  { %v2830_v0 = vadd.f32 1.0, %v3757_v27 }
0x1d44   :  { %v3759_v28 = vpop.eup %3758 }
0x1d45   :  { %v2832_v35 = vmul.f32 0.5, %v2830_v0  ;;  %v2831_v49 = vadd.f32 1.0, %v3759_v28 }
0x1d47   :  { %v2833_v21 = vmul.f32 0.5, %v2831_v49  ;;  %v2834_v45 = vmul.f32 %v2832_v35, %v2812_v14 }
0x1d49   :  { %v2835_v51 = vmul.f32 %v2833_v21, %v2815_v46 }
0x1d4b   :  { %v2836_v42 = vpack.c.bf16 %v2835_v51, %v2834_v45 }
0x1d4d   :  { %3541 = vmatmul.mubr.bf16.vlgmr.msra.gmra.mrb[72].mxu0 %v2836_v42 }
0x1e20   :  { %v2919_v31 = vpop.f32.mrb[72].mxu0 }
0x1e21   :  { %v2920_v6 = vadd.f32 %v3082_v54, %v2919_v31  ;;  %v3542_v32 = vpop.f32.mrb[73].mxu0 }
0x1e22   :  { %v2922_v33 = vpop.f32.mrb[74].mxu0 }
0x1e23   :  { %v2926_v13 = vadd.f32 %v2920_v6, %v2726_v1  ;;  %v2923_v15 = vadd.f32 %v3082_v54, %v2922_v33  ;;  %v3543_v19 = vpop.f32.mrb[75].mxu0  ;;  %v3083_v1 = vld [vmem:[%s4572_s3 + $0x16] ss:$0 sm:$0xff] }
0x1e25   :  { %v2927_v34 = vadd.f32 %v2923_v15, %v4516_v29  ;;  %2928 = vadd.xlane.f32.xlu0 %v2926_v13  ;;  %v2934_v37 = vmul.f32 %v2926_v13, %v2926_v13 }
0x1e27   :  { %2930 = vadd.xlane.f32.xlu1 %v2927_v34  ;;  %v2935_v38 = vmul.f32 %v2927_v34, %v2927_v34 }
0x1e29   :  { %2936 = vadd.xlane.f32.xlu0 %v2934_v37 }
0x1e2b   :  { %2938 = vadd.xlane.f32.xlu1 %v2935_v38 }
0x1eb2   :  { %v2929_v39 = vpop.xlane.xlu0 %2928 }
0x1eb3   :  { %v2932_v60 = vmul.f32 0.015625, %v2929_v39 }
0x1eb4   :  { %v2931_v40 = vpop.xlane.xlu1 %2930 }
0x1eb5   :  { %v2933_v41 = vmul.f32 0.015625, %v2931_v40  ;;  %v2942_v30 = vmul.f32 %v2932_v60, %v2932_v60  ;;  %v2946_v17 = vsub.f32 %v2926_v13, %v2932_v60 }
0x1eb6   :  { %v2937_v43 = vpop.xlane.xlu0 %2936 }
0x1eb7   :  { %v2940_v26 = vmul.f32 0.015625, %v2937_v43  ;;  %v2943_v47 = vmul.f32 %v2933_v41, %v2933_v41  ;;  %v2947_v29 = vsub.f32 %v2927_v34, %v2933_v41 }
0x1eb8   :  { %v2939_v44 = vpop.xlane.xlu1 %2938 }
0x1eb9   :  { %v2944_v52 = vsub.f32 %v2940_v26, %v2942_v30  ;;  %v2941_v53 = vmul.f32 0.015625, %v2939_v44 }
0x1ebb   :  { %v2948_v56 = vadd.f32 1e-12, %v2944_v52  ;;  %v2945_v61 = vsub.f32 %v2941_v53, %v2943_v47 }
0x1ebd   :  { %3760 = vrsqrt.f32 %v2948_v56  ;;  %v2949_v62 = vadd.f32 1e-12, %v2945_v61 }
0x1ebf   :  { %3762 = vrsqrt.f32 %v2949_v62 }
0x1ec7   :  { %v3761_v63 = vpop.eup %3760 }
0x1ec8   :  { %v2952_v2 = vmul.f32 %v3761_v63, %v2946_v17 }
0x1ec9   :  { %v3763_v3 = vpop.eup %3762 }
0x1eca   :  { %v2954_v5 = vmul.f32 %v3083_v1, %v2952_v2  ;;  %v2953_v7 = vmul.f32 %v3763_v3, %v2947_v29 }
0x1ecc   :  { %v2956_v9 = vadd.f32 %v3084_v4, %v2954_v5  ;;  %v2955_v10 = vmul.f32 %v3083_v1, %v2953_v7 }
0x1ece   :  { %2958 = vst [vmem:[%s4573_s4] sm:$0xff] %v2956_v9  ;;  %v2957_v11 = vadd.f32 %v3084_v4, %v2955_v10 }
0x1ed0   :  { %2959 = vst [vmem:[%s4573_s4 + $0x8] sm:$0xff] %v2957_v11 }

</bundles_post_ra>
